<compile_context>
chip_gen: v7x
topology: tpu7x:2x2x1
jax: 0.10.0
libtpu: 0.0.40
codegen_flags: <defaults>
</compile_context>

<pallas_src>
import functools

import jax
import jax.numpy as jnp
from jax.experimental import pallas as pl
from jax.experimental.pallas import tpu as pltpu

DNI_HIDDEN_SIZE = 1024
BN_EPS = 1e-5
LANE = 128
TN = 256  # layer2 output-feature tile; grid steps = H // TN


def _round_up(n, m):
    return ((n + m - 1) // m) * m


def _bn_relu_bf16(h, gamma, beta, inv_n):
    """Training-mode BatchNorm1d (biased batch variance) + ReLU, emitted bf16.

    s1/s2 come from one sweep over h (h*h feeds the second reduction directly);
    gamma is folded into a per-feature scale/shift so normalization is a single
    FMA, and the result is cast to bf16 in the same pass (no separate f32
    normalized activation is materialized).
    Note: var = E[x^2] - E[x]^2 in f32 - adequate for these activation ranges.
    """
    s1 = jnp.sum(h, axis=0, keepdims=True)
    s2 = jnp.sum(h * h, axis=0, keepdims=True)
    mean = s1 * inv_n
    var = s2 * inv_n - mean * mean            # biased (training-mode) variance
    scale = gamma * jax.lax.rsqrt(var + BN_EPS)
    shift = beta - mean * scale
    return jnp.maximum(h * scale + shift, 0.0).astype(jnp.bfloat16)


def dni_linear_kernel(x_ref, w1_ref, w2_ref, w3_ref, veca_ref, vecb_ref,
                      out_ref, h1_ref, acc_ref):
    """Feature tile j of layer2/layer3; layer1 runs once at j == 0.

    x:    (B, Din)      f32   resident (constant block index)
    w1:   (Din, H)      bf16  resident
    w2:   (H, TN)       bf16  streamed column block j
    w3:   (TN, OUT_PAD) bf16  streamed row block j
    veca: (8, H)        f32   rows = [g1, be1, b3 (zero-padded), 0...] resident
    vecb: (8, TN)       f32   rows = [g2, be2, 0...], streamed column block j
    out:  (B, OUT_PAD)  f32   lane-dense padded slab, written at the last step
    h1:   (B, H)        bf16  VMEM scratch (layer1 activation, persists)
    acc:  (B, OUT_PAD)  f32   VMEM scratch (layer3 accumulator, persists)
    """
    j = pl.program_id(0)
    batch = x_ref.shape[0]
    inv_n = 1.0 / batch
    out_pad = out_ref.shape[1]

    @pl.when(j == 0)
    def _():
        # layer1: Linear (bias dropped - cancelled by BN mean-subtract)
        #         -> BN1 -> ReLU, stored once as bf16 for the layer2 MXU path.
        h1 = jnp.dot(x_ref[...].astype(jnp.bfloat16), w1_ref[...],
                     preferred_element_type=jnp.float32)
        h1_ref[...] = _bn_relu_bf16(h1, veca_ref[0:1, :], veca_ref[1:2, :],
                                    inv_n)
        # layer3 accumulator starts at the (zero-padded) layer3 bias.
        acc_ref[...] = jnp.broadcast_to(veca_ref[2:3, :out_pad], acc_ref.shape)

    # layer2 feature tile j: (B, TN) = h1 @ w2[:, j*TN:(j+1)*TN] -> BN2 -> ReLU
    h2 = jnp.dot(h1_ref[...], w2_ref[...], preferred_element_type=jnp.float32)
    h2 = _bn_relu_bf16(h2, vecb_ref[0:1, :], vecb_ref[1:2, :], inv_n)

    # layer3 partial: acc += h2_j @ w3[j*TN:(j+1)*TN, :]
    acc_ref[...] += jnp.dot(h2, w3_ref[...], preferred_element_type=jnp.float32)

    @pl.when(j == pl.num_programs(0) - 1)
    def _():
        out_ref[...] = acc_ref[...].astype(out_ref.dtype)


@functools.lru_cache(maxsize=1)
def _physical_vmem_bytes():
    try:
        cap = getattr(pltpu.get_tpu_info(), "vmem_capacity_bytes", None)
        if cap:
            return int(cap)
    except Exception:
        pass
    return 64 << 20  # conservative default (v7x-sized VMEM)


@functools.partial(jax.jit, static_argnames=("conditioned",))
def dni_linear_forward(params, x, y=None, *, conditioned=False):
    """JAX wrapper mirroring dni_linear.forward(x, y)."""
    if conditioned:
        assert y is not None
        # torch.cat((x, y.unsqueeze(1).float()), 1) -- glue, done in plain JAX
        x = jnp.concatenate([x, y.astype(jnp.float32)[:, None]], axis=1)

    batch = x.shape[0]
    din = x.shape[1]
    hidden = params["w2"].shape[0]
    out_pad = params["w3p"].shape[1]
    input_dims = params["b3"].shape[1]

    tn = TN if hidden % TN == 0 else hidden
    n_steps = hidden // tn

    operands = (x, params["w1"], params["w2"], params["w3p"],
                params["vecA"], params["vecB"])

    # --- VMEM budget for the tiled structure --------------------------------
    resident = (batch * din * 4            # x (fetched once)
                + din * hidden * 2         # w1 bf16 (fetched once)
                + 8 * hidden * 4           # vecA
                + batch * out_pad * 4)     # output slab
    streamed_blk = (hidden * tn * 2        # w2 column block (bf16)
                    + tn * out_pad * 2     # w3 row block (bf16)
                    + 8 * tn * 4)          # vecB column block
    scratch = batch * hidden * 2 + batch * out_pad * 4   # h1 bf16 + acc f32
    temps = (batch * hidden * 4            # f32 h1 before BN/cast (j == 0 only)
             + 2 * batch * tn * 4          # f32 h2 tile + BN temporaries
             + batch * out_pad * 4)        # f32 layer3 partial
    vmem_est = resident + 2 * streamed_blk + scratch + temps

    cap = (_physical_vmem_bytes() * 3) // 4   # ~96 MiB v5e/v6e, ~48 MiB v7x
    assert vmem_est + (2 << 20) <= cap, (
        "batch too large for the feature-tiled dni_linear kernel on this TPU; "
        "tile the batch axis with two-pass BatchNorm statistics")
    # Headroom covers possible double-buffering of the constant-index blocks.
    vmem_limit = int(min(cap, max(vmem_est + resident + (4 << 20), 32 << 20)))

    cost = pl.CostEstimate(
        flops=2 * batch * (din * hidden + hidden * hidden + hidden * out_pad),
        transcendentals=2 * hidden,           # rsqrt vectors for BN1 + BN2
        bytes_accessed=int(sum(int(a.size) * a.dtype.itemsize for a in operands)
                           + batch * out_pad * 4),
    )

    grid_spec = pltpu.PrefetchScalarGridSpec(
        num_scalar_prefetch=0,
        grid=(n_steps,),
        in_specs=[
            pl.BlockSpec((batch, din), lambda j: (0, 0)),     # x      resident
            pl.BlockSpec((din, hidden), lambda j: (0, 0)),    # w1     resident
            pl.BlockSpec((hidden, tn), lambda j: (0, j)),     # w2 column block
            pl.BlockSpec((tn, out_pad), lambda j: (j, 0)),    # w3 row block
            pl.BlockSpec((8, hidden), lambda j: (0, 0)),      # vecA   resident
            pl.BlockSpec((8, tn), lambda j: (0, j)),          # vecB column blk
        ],
        out_specs=pl.BlockSpec((batch, out_pad), lambda j: (0, 0)),
        scratch_shapes=[
            pltpu.VMEM((batch, hidden), jnp.bfloat16),   # h1 activation
            pltpu.VMEM((batch, out_pad), jnp.float32),   # layer3 accumulator
        ],
    )

    out_full = pl.pallas_call(
        dni_linear_kernel,
        out_shape=jax.ShapeDtypeStruct((batch, out_pad), jnp.float32),
        grid_spec=grid_spec,
        compiler_params=pltpu.CompilerParams(
            dimension_semantics=("arbitrary",),
            vmem_limit_bytes=vmem_limit),
        cost_estimate=cost,
    )(*operands)

    # TODO(synk): at large batches let downstream consumers take the padded
    # (B, OUT_PAD) slab directly to skip this extra XLA copy.
    return out_full[:, :input_dims]


def init_dni_linear_params(key, input_dims, conditioned=False):
    """Deterministic params matching nn.Linear / nn.BatchNorm1d shapes."""
    dni_in = input_dims + 1 if conditioned else input_dims
    h = DNI_HIDDEN_SIZE
    out_pad = _round_up(max(input_dims, 1), LANE)
    assert out_pad <= h, "b3 packing into the (8, H) vecA slab needs out_pad <= H"

    def linear(k, fan_in, fan_out):
        # torch.nn.Linear default: U(-1/sqrt(fan_in), 1/sqrt(fan_in))
        kw, kb = jax.random.split(k)
        bound = float(fan_in) ** -0.5
        w = jax.random.uniform(kw, (fan_in, fan_out), jnp.float32, -bound, bound)
        b = jax.random.uniform(kb, (1, fan_out), jnp.float32, -bound, bound)
        return w, b

    k1, k2, k3 = jax.random.split(key, 3)
    w1, b1 = linear(k1, dni_in, h)
    w2, b2 = linear(k2, h, h)
    w3, b3 = linear(k3, h, input_dims)

    # BatchNorm1d default init: weight (gamma) = 1, bias (beta) = 0
    g1 = jnp.ones((1, h), jnp.float32)
    be1 = jnp.zeros((1, h), jnp.float32)
    g2 = jnp.ones((1, h), jnp.float32)
    be2 = jnp.zeros((1, h), jnp.float32)

    # Kernel-side packed / padded operands.
    w3p = jnp.zeros((h, out_pad), jnp.float32).at[:, :input_dims].set(w3)
    b3_row = jnp.zeros((1, h), jnp.float32).at[:, :input_dims].set(b3)
    vec_a = jnp.concatenate([g1, be1, b3_row, jnp.zeros((5, h), jnp.float32)], 0)
    vec_b = jnp.concatenate([g2, be2, jnp.zeros((6, h), jnp.float32)], 0)

    return {
        # kernel operands: bf16 weights (f32 MXU accumulation), packed vectors
        "w1": w1.astype(jnp.bfloat16),
        "w2": w2.astype(jnp.bfloat16),
        "w3p": w3p.astype(jnp.bfloat16),
        "vecA": vec_a,
        "vecB": vec_b,
        # f32 originals for the reference check / shape inference
        "w1_f32": w1, "b1": b1, "g1": g1, "be1": be1,
        "w2_f32": w2, "b2": b2, "g2": g2, "be2": be2,
        "w3_f32": w3, "b3": b3,
    }


def _reference_forward(params, x, y, conditioned, mimic_bf16=True):
    """Pure-JAX reference of the PyTorch forward (training-mode BN).

    Includes the layer1/layer2 Linear biases (the kernel drops them because
    they cancel exactly under the BN mean subtraction).
    """
    if conditioned:
        x = jnp.concatenate([x, y.astype(jnp.float32)[:, None]], axis=1)

    if mimic_bf16:
        def dot(a, w):
            return jnp.dot(a.astype(jnp.bfloat16), w.astype(jnp.bfloat16),
                           preferred_element_type=jnp.float32)
    else:
        def dot(a, w):
            return jnp.dot(a, w)

    def bn_relu(hh, g, b):
        m = jnp.mean(hh, axis=0, keepdims=True)
        v = jnp.mean((hh - m) ** 2, axis=0, keepdims=True)
        return jnp.maximum((hh - m) / jnp.sqrt(v + BN_EPS) * g + b, 0.0)

    h = bn_relu(dot(x, params["w1_f32"]) + params["b1"],
                params["g1"], params["be1"])
    h = bn_relu(dot(h, params["w2_f32"]) + params["b2"],
                params["g2"], params["be2"])
    return dot(h, params["w3_f32"]) + params["b3"]


if __name__ == "__main__":
    key = jax.random.PRNGKey(0)
    k_param, k_x, k_y = jax.random.split(key, 3)

    batch = 8
    input_dims = 32
    conditioned = True  # exercises the torch.cat((x, y.unsqueeze(1)), 1) path

    params = init_dni_linear_params(k_param, input_dims, conditioned=conditioned)
    x = jax.random.normal(k_x, (batch, input_dims), jnp.float32)
    y = jax.random.randint(k_y, (batch,), 0, 10)  # class labels, like DNI use

    out = dni_linear_forward(params, x, y, conditioned=conditioned)
    out = jax.block_until_ready(out)
    assert out.shape == (batch, input_dims), out.shape

    # Tight check vs a reference that mimics the kernel's bf16 matmul inputs.
    ref_bf16 = _reference_forward(params, x, y, conditioned, mimic_bf16=True)
    assert jnp.allclose(out, ref_bf16, atol=5e-3, rtol=5e-3), \
        "mismatch vs bf16-matmul reference"

    # Looser sanity check vs the full-f32 PyTorch-equivalent reference.
    ref_f32 = _reference_forward(params, x, y, conditioned, mimic_bf16=False)
    assert jnp.allclose(out, ref_f32, atol=5e-2, rtol=5e-2), \
        "mismatch vs f32 reference"

    print("KERNEL_OK")
</pallas_src>

<mosaic_0001>
module attributes {stable_mosaic.version = 11 : i64} {
  func.func @dni_linear_kernel(%arg0: i32, %arg1: memref<8x33xf32, #tpu.memory_space<vmem>>, %arg2: memref<33x1024xbf16, #tpu.memory_space<vmem>>, %arg3: memref<1024x256xbf16, #tpu.memory_space<vmem>>, %arg4: memref<256x128xbf16, #tpu.memory_space<vmem>>, %arg5: memref<8x1024xf32, #tpu.memory_space<vmem>>, %arg6: memref<8x256xf32, #tpu.memory_space<vmem>>, %arg7: memref<8x128xf32, #tpu.memory_space<vmem>>, %arg8: memref<8x1024xbf16, #tpu.memory_space<vmem>>, %arg9: memref<8x128xf32, #tpu.memory_space<vmem>>) attributes {dimension_semantics = [#tpu.dimension_semantics<arbitrary>], iteration_bounds = array<i64: 4>, scalar_prefetch = 0 : i64, scratch_operands = 2 : i64, tpu.core_type = #tpu.core_type<tc>, window_params = [{pipeline_mode = #tpu.pipeline_mode<synchronous>, transform_indices = @transform_0, window_bounds = array<i64: 8, 33>}, {pipeline_mode = #tpu.pipeline_mode<synchronous>, transform_indices = @transform_1, window_bounds = array<i64: 33, 1024>}, {transform_indices = @transform_2, window_bounds = array<i64: 1024, 256>}, {transform_indices = @transform_3, window_bounds = array<i64: 256, 128>}, {pipeline_mode = #tpu.pipeline_mode<synchronous>, transform_indices = @transform_4, window_bounds = array<i64: 8, 1024>}, {transform_indices = @transform_5, window_bounds = array<i64: 8, 256>}, {pipeline_mode = #tpu.pipeline_mode<synchronous>, transform_indices = @transform_6, window_bounds = array<i64: 8, 128>}]} {
    %c0_i32 = arith.constant 0 : i32
    %0 = arith.cmpi eq, %arg0, %c0_i32 : i32
    %1 = arith.extui %0 : i1 to i32
    %c0_i32_0 = arith.constant 0 : i32
    %2 = arith.cmpi ne, %1, %c0_i32_0 : i32
    scf.if %2 {
      %c0_21 = arith.constant 0 : index
      %c0_22 = arith.constant 0 : index
      %40 = vector.load %arg1[%c0_21, %c0_22] : memref<8x33xf32, #tpu.memory_space<vmem>>, vector<8x33xf32>
      %41 = arith.truncf %40 : vector<8x33xf32> to vector<8x33xbf16>
      %c0_23 = arith.constant 0 : index
      %c0_24 = arith.constant 0 : index
      %42 = vector.load %arg2[%c0_23, %c0_24] : memref<33x1024xbf16, #tpu.memory_space<vmem>>, vector<33x1024xbf16>
      %cst_25 = arith.constant dense<0.000000e+00> : vector<8x1024xf32>
      %43 = tpu.matmul %41, %42, %cst_25 {dimension_numbers = #tpu.dot_dimension_numbers<[1], [0], [0], [1], [0, 0, 1, 1], [], []>} : vector<8x33xbf16>, vector<33x1024xbf16>, vector<8x1024xf32> -> vector<8x1024xf32>
      %c0_26 = arith.constant 0 : index
      %c0_27 = arith.constant 0 : index
      %44 = vector.load %arg5[%c0_26, %c0_27] : memref<8x1024xf32, #tpu.memory_space<vmem>>, vector<1x1024xf32>
      %c1_28 = arith.constant 1 : index
      %c0_29 = arith.constant 0 : index
      %45 = vector.load %arg5[%c1_28, %c0_29] : memref<8x1024xf32, #tpu.memory_space<vmem>>, vector<1x1024xf32>
      %cst_30 = arith.constant dense<0.000000e+00> : vector<1024xf32>
      %46 = vector.multi_reduction <add>, %43, %cst_30 [0] : vector<8x1024xf32> to vector<1024xf32>
      %47 = vector.shape_cast %46 : vector<1024xf32> to vector<1x1024xf32>
      %48 = arith.mulf %43, %43 : vector<8x1024xf32>
      %cst_31 = arith.constant dense<0.000000e+00> : vector<1024xf32>
      %49 = vector.multi_reduction <add>, %48, %cst_31 [0] : vector<8x1024xf32> to vector<1024xf32>
      %50 = vector.shape_cast %49 : vector<1024xf32> to vector<1x1024xf32>
      %cst_32 = arith.constant 1.250000e-01 : f32
      %51 = vector.broadcast %cst_32 : f32 to vector<1x1024xf32>
      %52 = arith.mulf %47, %51 : vector<1x1024xf32>
      %cst_33 = arith.constant 1.250000e-01 : f32
      %53 = vector.broadcast %cst_33 : f32 to vector<1x1024xf32>
      %54 = arith.mulf %50, %53 : vector<1x1024xf32>
      %55 = arith.mulf %52, %52 : vector<1x1024xf32>
      %56 = arith.subf %54, %55 : vector<1x1024xf32>
      %cst_34 = arith.constant 9.99999974E-6 : f32
      %57 = vector.broadcast %cst_34 : f32 to vector<1x1024xf32>
      %58 = arith.addf %56, %57 : vector<1x1024xf32>
      %59 = math.rsqrt %58 : vector<1x1024xf32>
      %60 = arith.mulf %44, %59 : vector<1x1024xf32>
      %61 = arith.mulf %52, %60 : vector<1x1024xf32>
      %62 = arith.subf %45, %61 : vector<1x1024xf32>
      %63 = vector.broadcast %60 : vector<1x1024xf32> to vector<8x1024xf32>
      %64 = arith.mulf %43, %63 : vector<8x1024xf32>
      %65 = vector.broadcast %62 : vector<1x1024xf32> to vector<8x1024xf32>
      %66 = arith.addf %64, %65 : vector<8x1024xf32>
      %cst_35 = arith.constant 0.000000e+00 : f32
      %67 = vector.broadcast %cst_35 : f32 to vector<8x1024xf32>
      %68 = arith.maximumf %66, %67 : vector<8x1024xf32>
      %69 = arith.truncf %68 : vector<8x1024xf32> to vector<8x1024xbf16>
      %c0_36 = arith.constant 0 : index
      %c0_37 = arith.constant 0 : index
      %70 = vector.load %arg8[%c0_36, %c0_37] : memref<8x1024xbf16, #tpu.memory_space<vmem>>, vector<8x1024xbf16>
      tpu.vector_store %arg8[%c0_36, %c0_37], %69 {strides = array<i32>} : memref<8x1024xbf16, #tpu.memory_space<vmem>>, vector<8x1024xbf16>,
      %c2 = arith.constant 2 : index
      %c0_38 = arith.constant 0 : index
      %71 = vector.load %arg5[%c2, %c0_38] : memref<8x1024xf32, #tpu.memory_space<vmem>>, vector<1x128xf32>
      %72 = vector.shape_cast %71 : vector<1x128xf32> to vector<1x128xf32>
      %73 = vector.broadcast %72 : vector<1x128xf32> to vector<8x128xf32>
      %c0_39 = arith.constant 0 : index
      %c0_40 = arith.constant 0 : index
      %74 = vector.load %arg9[%c0_39, %c0_40] : memref<8x128xf32, #tpu.memory_space<vmem>>, vector<8x128xf32>
      tpu.vector_store %arg9[%c0_39, %c0_40], %73 {strides = array<i32>} : memref<8x128xf32, #tpu.memory_space<vmem>>, vector<8x128xf32>,
    } else {
    }
    %c0 = arith.constant 0 : index
    %c0_1 = arith.constant 0 : index
    %3 = vector.load %arg8[%c0, %c0_1] : memref<8x1024xbf16, #tpu.memory_space<vmem>>, vector<8x1024xbf16>
    %c0_2 = arith.constant 0 : index
    %c0_3 = arith.constant 0 : index
    %4 = vector.load %arg3[%c0_2, %c0_3] : memref<1024x256xbf16, #tpu.memory_space<vmem>>, vector<1024x256xbf16>
    %cst = arith.constant dense<0.000000e+00> : vector<8x256xf32>
    %5 = tpu.matmul %3, %4, %cst {dimension_numbers = #tpu.dot_dimension_numbers<[1], [0], [0], [1], [0, 0, 1, 1], [], []>} : vector<8x1024xbf16>, vector<1024x256xbf16>, vector<8x256xf32> -> vector<8x256xf32>
    %c0_4 = arith.constant 0 : index
    %c0_5 = arith.constant 0 : index
    %6 = vector.load %arg6[%c0_4, %c0_5] : memref<8x256xf32, #tpu.memory_space<vmem>>, vector<1x256xf32>
    %c1 = arith.constant 1 : index
    %c0_6 = arith.constant 0 : index
    %7 = vector.load %arg6[%c1, %c0_6] : memref<8x256xf32, #tpu.memory_space<vmem>>, vector<1x256xf32>
    %cst_7 = arith.constant dense<0.000000e+00> : vector<256xf32>
    %8 = vector.multi_reduction <add>, %5, %cst_7 [0] : vector<8x256xf32> to vector<256xf32>
    %9 = vector.shape_cast %8 : vector<256xf32> to vector<1x256xf32>
    %10 = arith.mulf %5, %5 : vector<8x256xf32>
    %cst_8 = arith.constant dense<0.000000e+00> : vector<256xf32>
    %11 = vector.multi_reduction <add>, %10, %cst_8 [0] : vector<8x256xf32> to vector<256xf32>
    %12 = vector.shape_cast %11 : vector<256xf32> to vector<1x256xf32>
    %cst_9 = arith.constant 1.250000e-01 : f32
    %13 = vector.broadcast %cst_9 : f32 to vector<1x256xf32>
    %14 = arith.mulf %9, %13 : vector<1x256xf32>
    %cst_10 = arith.constant 1.250000e-01 : f32
    %15 = vector.broadcast %cst_10 : f32 to vector<1x256xf32>
    %16 = arith.mulf %12, %15 : vector<1x256xf32>
    %17 = arith.mulf %14, %14 : vector<1x256xf32>
    %18 = arith.subf %16, %17 : vector<1x256xf32>
    %cst_11 = arith.constant 9.99999974E-6 : f32
    %19 = vector.broadcast %cst_11 : f32 to vector<1x256xf32>
    %20 = arith.addf %18, %19 : vector<1x256xf32>
    %21 = math.rsqrt %20 : vector<1x256xf32>
    %22 = arith.mulf %6, %21 : vector<1x256xf32>
    %23 = arith.mulf %14, %22 : vector<1x256xf32>
    %24 = arith.subf %7, %23 : vector<1x256xf32>
    %25 = vector.broadcast %22 : vector<1x256xf32> to vector<8x256xf32>
    %26 = arith.mulf %5, %25 : vector<8x256xf32>
    %27 = vector.broadcast %24 : vector<1x256xf32> to vector<8x256xf32>
    %28 = arith.addf %26, %27 : vector<8x256xf32>
    %cst_12 = arith.constant 0.000000e+00 : f32
    %29 = vector.broadcast %cst_12 : f32 to vector<8x256xf32>
    %30 = arith.maximumf %28, %29 : vector<8x256xf32>
    %31 = arith.truncf %30 : vector<8x256xf32> to vector<8x256xbf16>
    %c0_13 = arith.constant 0 : index
    %c0_14 = arith.constant 0 : index
    %32 = vector.load %arg9[%c0_13, %c0_14] : memref<8x128xf32, #tpu.memory_space<vmem>>, vector<8x128xf32>
    %c0_15 = arith.constant 0 : index
    %c0_16 = arith.constant 0 : index
    %33 = vector.load %arg4[%c0_15, %c0_16] : memref<256x128xbf16, #tpu.memory_space<vmem>>, vector<256x128xbf16>
    %cst_17 = arith.constant dense<0.000000e+00> : vector<8x128xf32>
    %34 = tpu.matmul %31, %33, %cst_17 {dimension_numbers = #tpu.dot_dimension_numbers<[1], [0], [0], [1], [0, 0, 1, 1], [], []>} : vector<8x256xbf16>, vector<256x128xbf16>, vector<8x128xf32> -> vector<8x128xf32>
    %35 = arith.addf %32, %34 : vector<8x128xf32>
    %c0_18 = arith.constant 0 : index
    %c0_19 = arith.constant 0 : index
    %36 = vector.load %arg9[%c0_18, %c0_19] : memref<8x128xf32, #tpu.memory_space<vmem>>, vector<8x128xf32>
    tpu.vector_store %arg9[%c0_18, %c0_19], %35 {strides = array<i32>} : memref<8x128xf32, #tpu.memory_space<vmem>>, vector<8x128xf32>,
    %c3_i32 = arith.constant 3 : i32
    %37 = arith.cmpi eq, %arg0, %c3_i32 : i32
    %38 = arith.extui %37 : i1 to i32
    %c0_i32_20 = arith.constant 0 : i32
    %39 = arith.cmpi ne, %38, %c0_i32_20 : i32
    scf.if %39 {
      %c0_21 = arith.constant 0 : index
      %c0_22 = arith.constant 0 : index
      %40 = vector.load %arg9[%c0_21, %c0_22] : memref<8x128xf32, #tpu.memory_space<vmem>>, vector<8x128xf32>
      %c0_23 = arith.constant 0 : index
      %c0_24 = arith.constant 0 : index
      %41 = vector.load %arg7[%c0_23, %c0_24] : memref<8x128xf32, #tpu.memory_space<vmem>>, vector<8x128xf32>
      tpu.vector_store %arg7[%c0_23, %c0_24], %40 {strides = array<i32>} : memref<8x128xf32, #tpu.memory_space<vmem>>, vector<8x128xf32>,
    } else {
    }
    return
  }
  func.func @transform_0(%arg0: i32) -> (i32, i32) {
    %c0_i32 = arith.constant 0 : i32
    %c0_i32_0 = arith.constant 0 : i32
    %c0_i32_1 = arith.constant 0 : i32
    return %c0_i32, %c0_i32_0 : i32, i32
  }
  func.func @transform_1(%arg0: i32) -> (i32, i32) {
    %c0_i32 = arith.constant 0 : i32
    %c0_i32_0 = arith.constant 0 : i32
    %c0_i32_1 = arith.constant 0 : i32
    return %c0_i32, %c0_i32_0 : i32, i32
  }
  func.func @transform_2(%arg0: i32) -> (i32, i32) {
    %c0_i32 = arith.constant 0 : i32
    %c0_i32_0 = arith.constant 0 : i32
    return %c0_i32, %arg0 : i32, i32
  }
  func.func @transform_3(%arg0: i32) -> (i32, i32) {
    %c0_i32 = arith.constant 0 : i32
    %c0_i32_0 = arith.constant 0 : i32
    return %arg0, %c0_i32 : i32, i32
  }
  func.func @transform_4(%arg0: i32) -> (i32, i32) {
    %c0_i32 = arith.constant 0 : i32
    %c0_i32_0 = arith.constant 0 : i32
    %c0_i32_1 = arith.constant 0 : i32
    return %c0_i32, %c0_i32_0 : i32, i32
  }
  func.func @transform_5(%arg0: i32) -> (i32, i32) {
    %c0_i32 = arith.constant 0 : i32
    %c0_i32_0 = arith.constant 0 : i32
    return %c0_i32, %arg0 : i32, i32
  }
  func.func @transform_6(%arg0: i32) -> (i32, i32) {
    %c0_i32 = arith.constant 0 : i32
    %c0_i32_0 = arith.constant 0 : i32
    %c0_i32_1 = arith.constant 0 : i32
    return %c0_i32, %c0_i32_0 : i32, i32
  }
}

</mosaic_0001>

<bundles_post_ra>
// kernel: dni_linear_forward.1
= control target key start
LH: loop header
LB: loop body
LE: loop exit
PB: predicated region body
PF: predicated region fallthrough
CT: control target
= control target key end

     0   :  { %s3919_s0 = inlined_call_operand.vmem [shape: f32[8,33], index: 0, kind: input, shape index: {}]   ;;  %s3920_s1 = inlined_call_operand.hbm [shape: bf16[33,1024], index: 1, kind: input, shape index: {}]   ;;  %s3921_s2 = inlined_call_operand.hbm [shape: bf16[1024,1024], index: 2, kind: input, shape index: {}]   ;;  %s3922_s3 = inlined_call_operand.hbm [shape: bf16[1024,128], index: 3, kind: input, shape index: {}]   ;;  %s3923_s4 = inlined_call_operand.hbm [shape: f32[8,1024], index: 4, kind: input, shape index: {}]   ;;  %s3924_s5 = inlined_call_operand.hbm [shape: f32[8,1024], index: 5, kind: input, shape index: {}]   ;;  %s3925_s6 = inlined_call_operand.hbm [shape: f32[8,128], index: 6, kind: output, shape index: {}]  }
   0x1   :  { %3940 = sst [smem:[#allocation22_spill]] %s3920_s1 }
   0x2   :  { %3941 = sst [smem:[#allocation23_spill]] %s3921_s2 }
   0x3   :  { %11 = vsyncpa [#allocation5], 0 }
   0x4   :  { %12 = vsyncpa [#allocation8], 0 }
   0x5   :  { %14 = vsyncpa [#allocation8 + $0x1], 0 }
   0x6   :  { %15 = vsyncpa [#allocation11], 0 }
   0x7   :  { %16 = vsyncpa [#allocation6], 0  ;;  %s3337_s21 = smov 0   ;;  %s3339_s22 = smov 0  }
   0x8   :  { %s3341_s23 = smov 0   ;;  %s3343_s24 = smov 0  }
   0x9 LB: > { %3942 = sst [smem:[#allocation19_spill]] %s3281_s23  ;;  %s3356_s25 = sadd.s32 4294967295, %s3285_s24   ;;  %s3285_s24 = sphi %s3343_s24, %s3968_s24   ;;  %s3281_s23 = sphi %s3341_s23, %s3970_s23   ;;  %s3277_s22 = sphi %s3339_s22, %s3972_s22   ;;  %s3273_s21 = sphi %s3337_s21, %s3971_s21  }
   0xa   : > { %s3359_s26 = sadd.s32 1, %s3285_s24   ;;  %s71_s28 = sadd.s32 1, %s3281_s23 }
   0xb   : > { %3943 = sst [smem:[#allocation20_spill]] %s3359_s26  ;;  %s68_s27 = ssub.s32 %s3285_s24, %s3359_s26 }
   0xc   : > { %p69_p0 = scmp.eq.s32.totalorder %s68_s27, 0  ;;  %p78_p1 = scmp.ne.s32.totalorder %s3281_s23, %s3277_s22 }
   0xd   : > { %p79_p2 = scmp.eq.s32.totalorder %s3285_s24, 0  ;;  %p84_p3 = scmp.ne.s32.totalorder %s3277_s22, %s3273_s21 }
   0xe   : > { %s3369_s29 = scalar_select %p69_p0, %s3281_s23, %s71_s28  }
   0xf   : > { %p3371_p4 = por %p79_p2, %p78_p1  ;;  %p3926_p5 = scmp.eq.s32.totalorder %s3356_s25, 0 }
  0x10   : > { %3944 = sst [smem:[#allocation21_spill]] %s3369_s29  ;;  %p2484_p6 = scmp.ge.s32.totalorder %s3285_s24, 1 }
  0x11   : > { %p189_p7 = scmp.lt.s32.totalorder %s3285_s24, 5  ;;  %p3380_p8 = por %p3926_p5, %p84_p3 }
  0x12   : > { %s3287_s9 = smov [#allocation4]   ;;  %p2770_p13 = scmp.lt.s32.totalorder %s3285_s24, 4 }
  0x13   : > { %s3946_s7 = scalar_select %p3380_p8, 1, 0 }
  0x14   : > { %p3385_p10 = pnand %p2484_p6, %p189_p7  ;;  %s204_s10 = sshll.u32 %s3287_s9, 4  ;;  %s205_s10 = int_to_ptr.vmem [resolvable:$true] %s204_s10 }
  0x15   : > { %s3933_s12 = sand.u32 1, %s3285_s24   ;;  %s3400_s13 = sand.u32 1, %s3281_s23  }
  0x16   : > { %s3947_s8 = scalar_select %p3385_p10, 1, 0 }
  0x17   : > { %p2751_p11 = pneg %p3385_p10  ;;  %p3404_p0 = pnand %p2770_p13, %p3371_p4 }
  0x18   : > { %s3950_s1 = sld [smem:[#allocation22_spill]] }
  0x19   : > { %p3393_p12 = pnand %p2751_p11, %p3926_p5 }
  0x1a   : > { %s3949_s14 = scalar_select %p3404_p0, 1, 0 }
  0x1b   : > { %s3948_s11 = scalar_select %p3393_p12, 1, 0 }
  0x1c   : > { %p3930_p2 = pneg %p3393_p12 }
  0x1e   : > { %s3063_s17 = scalar_lea.hbm %s3950_s1, 2560 }
  0x1f   : > { %p3064_p1 = scmp.ne.s32.totalorder %s3950_s1, %s3063_s17  ;;  %p3070_p4 = scmp.lt.u32.totalorder %s3063_s17, %s3950_s1 }
  0x21   : > { %p3066_p3 = pnand %p3930_p2, %p3064_p1 }
  0x23   : > { %p3067_p6 = pneg %p3066_p3 }
  0x25   : > { %p3072_p7 = pnand %p3070_p4, %p3067_p6 }
  0x27   : > { %3075 = shalt.err (!%p3072_p7)
}
  0x28   : > { %s3076_s27 = scalar_lea.vmem %s205_s10, 2560  ;;  %p3084_p5 = scmp.lt.s32.totalorder %s205_s10, %s205_s10 }
  0x29   : > { %p3077_p11 = scmp.ne.s32.totalorder %s205_s10, %s3076_s27  ;;  %p3085_p8 = scmp.lt.s32.totalorder %s3076_s27, %s3076_s27 }
  0x2b   : > { %p3079_p13 = pnand %p3077_p11, %p3930_p2  ;;  %p3086_p10 = por %p3085_p8, %p3084_p5 }
  0x2d   : > { %p3080_p9 = pneg %p3079_p13 }
  0x2f   : > { %p3087_p0 = pnand %p3086_p10, %p3080_p9 }
  0x31   : > { %3090 = shalt.err (!%p3087_p0)
}
  0x32   : > { %s3288_s28 = smov 512   ;;  %s3289_s30 = smov 32  }
  0x33   : > { %2754 = dma.hbm_to_vmem [thread:$0]  (!%p3393_p12), %s3950_s1, 2560, %s205_s10, [#allocation5], %s3288_s28, %s3288_s28, %s3289_s30  }
  0x34   : > { %s2488_s16 = sshll.u32 %s3400_s13, 10  ;;  %s2694_s17 = sshll.u32 %s3285_s24, 7 }
  0x35   : > { %s3951_s2 = sld [smem:[#allocation23_spill]]  ;;  %s233_s21 = scalar_lea.vmem [#allocation7], %s2488_s16 }
  0x36   : > { %s240_s27 = sshll.u32 %s233_s21, 4  ;;  %s3443_s29 = scalar_lea.sflag [#allocation8], %s3933_s12  ;;  %s3439_s27 = int_to_ptr.vmem [resolvable:$true] %s240_s27 }
  0x37   : > { %p3952_p8 = scmp.ne.s32.totalorder %s3949_s14, 0 }
  0x39   : > { %p3449_p9 = pneg %p3952_p8 }
  0x3b   : > { %s3437_s20 = scalar_lea.hbm %s3951_s2, %s2694_s17  ;;  %s3096_s16 = scalar_lea.hbm %s3951_s2, 65536 }
  0x3c   : > { %s3091_s9 = scalar_lea.hbm %s3437_s20, 16384  ;;  %p3097_p1 = scmp.lt.u32.totalorder %s3437_s20, %s3951_s2 }
  0x3d   : > { %p3092_p5 = scmp.ne.s32.totalorder %s3437_s20, %s3091_s9  ;;  %p3098_p3 = scmp.lt.u32.totalorder %s3096_s16, %s3091_s9 }
  0x3e   : > { %s3953_s10 = scalar_select %p3449_p9, 1, 0 }
  0x3f   : > { %p3094_p10 = pnand %p3449_p9, %p3092_p5  ;;  %p3099_p6 = por %p3098_p3, %p3097_p1 }
  0x40   : > { %p3100_p4 = scmp.lt.u32.totalorder %s3091_s9, %s3437_s20 }
  0x41   : > { %p3095_p0 = pneg %p3094_p10 }
  0x42   : > { %p3101_p7 = por %p3100_p4, %p3099_p6 }
  0x44   : > { %p3102_p11 = pnand %p3101_p7, %p3095_p0 }
  0x46   : > { %3105 = shalt.err (!%p3102_p11)
}
  0x47   : > { %s3106_s19 = scalar_lea.vmem %s3439_s27, 16384  ;;  %s3290_s21 = smov [#allocation7]  }
  0x48   : > { %p3107_p13 = scmp.ne.s32.totalorder %s3439_s27, %s3106_s19  ;;  %s3111_s30 = sshll.u32 %s3290_s21, 4  ;;  %s3112_s30 = int_to_ptr.vmem [resolvable:$false] %s3111_s30 }
  0x49   : > { %s3113_s15 = scalar_lea.vmem %s3112_s30, 32768  ;;  %p3114_p2 = scmp.lt.s32.totalorder %s3439_s27, %s3112_s30 }
  0x4a   : > { %p3109_p5 = pnand %p3107_p13, %p3449_p9  ;;  %p3115_p12 = scmp.lt.s32.totalorder %s3113_s15, %s3106_s19 }
  0x4c   : > { %p3110_p10 = pneg %p3109_p5  ;;  %p3116_p1 = por %p3115_p12, %p3114_p2 }
  0x4e   : > { %p3117_p3 = pnand %p3116_p1, %p3110_p10 }
  0x50   : > { %3120 = shalt.err (!%p3117_p3)
}
  0x51   : > { %s3291_s9 = smov 128   ;;  %s3292_s16 = smov 8  }
  0x52   : > { %2761 = dma.hbm_to_vmem [thread:$0]  (!%p3952_p8), %s3437_s20, 16384, %s3439_s27, %s3443_s29, %s3288_s28, %s3291_s9, %s3292_s16  }
  0x53   : > { %s2491_s17 = sshll.u32 %s3400_s13, 7  ;;  %s3293_s18 = smov [#allocation10]  }
  0x54   : > { %s218_s21 = sshll.u32 %s3293_s18, 4  ;;  %s2695_s19 = sshll.u32 %s3285_s24, 11  ;;  %s219_s21 = int_to_ptr.vmem [resolvable:$true] %s218_s21 }
  0x55   : > { %s3121_s12 = scalar_lea.hbm %s3923_s4, 1024  ;;  %p3954_p2 = scmp.ne.s32.totalorder %s3948_s11, 0 }
  0x56   : > { %p3122_p12 = scmp.ne.s32.totalorder %s3923_s4, %s3121_s12  ;;  %p3128_p7 = scmp.lt.u32.totalorder %s3121_s12, %s3923_s4 }
  0x57   : > { %p3955_p0 = pneg %p3954_p2 }
  0x59   : > { %p3124_p6 = pnand %p3122_p12, %p3955_p0 }
  0x5b   : > { %p3125_p4 = pneg %p3124_p6 }
  0x5d   : > { %p3130_p11 = pnand %p3128_p7, %p3125_p4 }
  0x5f   : > { %3133 = shalt.err (!%p3130_p11)
}
  0x60   : > { %s3134_s28 = scalar_lea.vmem %s219_s21, 1024  ;;  %p3956_p5 = pmov %p3955_p0 }
  0x61   : > { %p3135_p13 = scmp.ne.s32.totalorder %s219_s21, %s3134_s28  ;;  %p3142_p3 = scmp.lt.s32.totalorder %s219_s21, %s219_s21 }
  0x62   : > { %p3143_p8 = scmp.lt.s32.totalorder %s3134_s28, %s3134_s28 }
  0x63   : > { %p3137_p10 = pnand %p3135_p13, %p3956_p5 }
  0x64   : > { %p3144_p9 = por %p3143_p8, %p3142_p3 }
  0x65   : > { %p3138_p1 = pneg %p3137_p10 }
  0x67   : > { %p3145_p0 = pnand %p3144_p9, %p3138_p1 }
  0x69   : > { %3148 = shalt.err (!%p3145_p0)
}
  0x6a   : > { %2757 = dma.hbm_to_vmem [thread:$0]  (!%p3954_p2), %s3923_s4, 1024, %s219_s21, [#allocation11]  }
  0x6b   : > { %s3499_s12 = scalar_lea.hbm %s3922_s3, %s2695_s19  ;;  %s254_s20 = scalar_lea.vmem [#allocation9], %s2491_s17 }
  0x6c   : > { %s261_s27 = sshll.u32 %s254_s20, 4  ;;  %s3149_s9 = scalar_lea.hbm %s3499_s12, 2048  ;;  %s3501_s27 = int_to_ptr.vmem [resolvable:$true] %s261_s27 }
  0x6d   : > { %p3150_p8 = scmp.ne.s32.totalorder %s3499_s12, %s3149_s9  ;;  %p3957_p9 = scmp.ne.s32.totalorder %s3953_s10, 0 }
  0x6e   : > { %s3154_s18 = scalar_lea.hbm %s3922_s3, 8192  ;;  %p3155_p2 = scmp.lt.u32.totalorder %s3499_s12, %s3922_s3 }
  0x6f   : > { %p3152_p12 = pnand %p3150_p8, %p3957_p9  ;;  %p3156_p4 = scmp.lt.u32.totalorder %s3154_s18, %s3149_s9 }
  0x70   : > { %p3158_p11 = scmp.lt.u32.totalorder %s3149_s9, %s3499_s12 }
  0x71   : > { %p3153_p6 = pneg %p3152_p12  ;;  %p3157_p7 = por %p3156_p4, %p3155_p2 }
  0x73   : > { %p3159_p13 = por %p3158_p11, %p3157_p7 }
  0x75   : > { %p3160_p5 = pnand %p3159_p13, %p3153_p6 }
  0x77   : > { %3163 = shalt.err (!%p3160_p5)
}
  0x78   : > { %s3164_s17 = scalar_lea.vmem %s3501_s27, 2048  ;;  %s3294_s30 = smov [#allocation9]  }
  0x79   : > { %p3165_p10 = scmp.ne.s32.totalorder %s3501_s27, %s3164_s17  ;;  %s3169_s15 = sshll.u32 %s3294_s30, 4  ;;  %s3170_s15 = int_to_ptr.vmem [resolvable:$false] %s3169_s15 }
  0x7a   : > { %s3171_s28 = scalar_lea.vmem %s3170_s15, 4096  ;;  %p3172_p0 = scmp.lt.s32.totalorder %s3501_s27, %s3170_s15 }
  0x7b   : > { %p3167_p1 = pnand %p3165_p10, %p3957_p9  ;;  %p3173_p8 = scmp.lt.s32.totalorder %s3171_s28, %s3164_s17 }
  0x7d   : > { %p3168_p3 = pneg %p3167_p1  ;;  %p3174_p12 = por %p3173_p8, %p3172_p0 }
  0x7f   : > { %p3175_p2 = pnand %p3174_p12, %p3168_p3 }
  0x81   : > { %3178 = shalt.err (!%p3175_p2)
}
  0x82   : > { %s3295_s1 = smov 64   ;;  %s3296_s2 = smov 4  }
  0x83   : > { %p3958_p6 = scmp.ne.s32.totalorder %s3949_s14, 0  ;;  %s2494_s23 = sshll.u32 %s3400_s13, 4 }
  0x84   : > { %s2696_s26 = sshll.u32 %s3285_s24, 8  ;;  %s275_s16 = scalar_lea.vmem [#allocation12], %s2494_s23 }
  0x85   : > { %2764 = dma.hbm_to_vmem [thread:$0]  (!%p3958_p6), %s3499_s12, 2048, %s3501_s27, %s3443_s29, %s3295_s1, %s3295_s1, %s3296_s2  }
  0x86   : > { %s3530_s11 = scalar_lea.hbm %s3924_s5, %s2696_s26  ;;  %s283_s18 = sshll.u32 %s275_s16, 4  ;;  %s284_s18 = int_to_ptr.vmem [resolvable:$true] %s283_s18 }
  0x87   : > { %s3959_s21 = sand.u32 1, %s3285_s24   ;;  %s3179_s17 = scalar_lea.hbm %s3530_s11, 256 }
  0x88   : > { %s272_s19 = scalar_lea.sflag [#allocation5], %s3959_s21  ;;  %p3180_p4 = scmp.ne.s32.totalorder %s3530_s11, %s3179_s17 }
  0x89   : > { %s3184_s12 = scalar_lea.hbm %s3924_s5, 1024  ;;  %p3185_p13 = scmp.lt.u32.totalorder %s3530_s11, %s3924_s5 }
  0x8a   : > { %p3182_p7 = pnand %p3180_p4, %p3957_p9  ;;  %p3186_p5 = scmp.lt.u32.totalorder %s3184_s12, %s3179_s17 }
  0x8b   : > { %p3188_p1 = scmp.lt.u32.totalorder %s3179_s17, %s3530_s11 }
  0x8c   : > { %p3183_p11 = pneg %p3182_p7  ;;  %p3187_p10 = por %p3186_p5, %p3185_p13 }
  0x8e   : > { %p3189_p3 = por %p3188_p1, %p3187_p10 }
  0x90   : > { %p3190_p0 = pnand %p3189_p3, %p3183_p11 }
  0x92   : > { %3193 = shalt.err (!%p3190_p0)
}
  0x93   : > { %s3194_s24 = scalar_lea.vmem %s284_s18, 256  ;;  %s3297_s15 = smov [#allocation12]  }
  0x94   : > { %p3195_p8 = scmp.ne.s32.totalorder %s284_s18, %s3194_s24  ;;  %s3199_s28 = sshll.u32 %s3297_s15, 4  ;;  %s3200_s28 = int_to_ptr.vmem [resolvable:$false] %s3199_s28 }
  0x95   : > { %s3201_s1 = scalar_lea.vmem %s3200_s28, 512  ;;  %p3202_p4 = scmp.lt.s32.totalorder %s284_s18, %s3200_s28 }
  0x96   : > { %p3197_p12 = pnand %p3195_p8, %p3957_p9  ;;  %p3203_p7 = scmp.lt.s32.totalorder %s3201_s1, %s3194_s24 }
  0x98   : > { %p3198_p2 = pneg %p3197_p12  ;;  %p3204_p6 = por %p3203_p7, %p3202_p4 }
  0x9a   : > { %p3205_p5 = pnand %p3204_p6, %p3198_p2 }
  0x9c   : > { %3208 = shalt.err (!%p3205_p5)
}
  0x9d   : > { %p3960_p13 = scmp.ne.s32.totalorder %s3949_s14, 0  ;;  %p3961_p11 = scmp.ne.s32.totalorder %s3947_s8, 0 }
  0x9e   : > { %p3962_p10 = scmp.eq.s32.totalorder (!%p3961_p11), %s3356_s25, 0 }
  0x9f   : > { %2767 = dma.hbm_to_vmem [thread:$0]  (!%p3960_p13), %s3530_s11, 256, %s284_s18, %s272_s19  }
  0xa0   : > { %292 = sbr.rel (%p3961_p11) target bundleno = 1159 (0x487), region = 44 }
  0xa7   : > { %3252 = dma.done.wait (%p3962_p10), [#allocation5], 2560   ;;  %p3963_p9 = pmov %p3962_p10 }
  0xa8   : > { %s298_s10 = sand.u32 1, %s3356_s25   ;;  %s300_s2 = sand.u32 1, %s3277_s22  }
  0xa9   : > { %3254 = vsyncadd (%p3963_p9), [#allocation5], 4294964736  ;;  %s2499_s23 = sshll.u32 %s300_s2, 10  ;;  %s299_s26 = scalar_lea.sflag [#allocation8], %s298_s10 }
  0xaa   : > { %s3559_s20 = scalar_lea.vmem [#allocation7], %s2499_s23  ;;  %p3964_p6 = scmp.ne.s32.totalorder %s3946_s7, 0 }
  0xac   : > { %3256 = dma.done.wait (%p3964_p6), %s299_s26, 18432  }
  0xad   : > { %3258 = vsyncadd (%p3964_p6), %s299_s26, 4294948864  ;;  %s2500_s8 = sshll.u32 %s300_s2, 7  ;;  %p3965_p1 = pmov %p3963_p9 }
  0xae   : > { %s3565_s14 = scalar_lea.vmem [#allocation9], %s2500_s8 }
  0xaf   : > { %3260 = dma.done.wait (%p3965_p1), [#allocation11], 1024   ;;  %p3966_p3 = pmov %p3965_p1 }
  0xb0   : > { %s2502_s9 = sshll.u32 %s300_s2, 4  ;;  %s321_s11 = scalar_lea.sflag [#allocation5], %s298_s10 }
  0xb1   : > { %3262 = vsyncadd (%p3966_p3), [#allocation11], 4294966272  ;;  %s3571_s16 = scalar_lea.vmem [#allocation12], %s2502_s9 }
  0xb2   : > { %3264 = dma.done.wait (%p3964_p6), %s321_s11, 256  }
  0xb3   : > { %3266 = vsyncadd (%p3964_p6), %s321_s11, 4294967040  ;;  %p3967_p0 = scmp.ne.s32.totalorder %s3356_s25, 0 }
  0xb4   : > { %v368_v0 = vld [vmem:[#allocation4] sm:$0xff] (!%p3967_p0)  ;;  %v369_v2 = vld [vmem:[#allocation4 + $0x8] sm:$0xff] (!%p3967_p0)  ;;  %vm492_vm0 = vcmask (!%p3967_p0), 1040384   ;;  %v3298_v8 = vmov (!%p3967_p0), 0   ;;  %v370_v26 = vld [vmem:[#allocation4 + $0x10] sm:$0xff] (!%p3967_p0)  ;;  %vm488_vm1 = vcmask (!%p3967_p0), 269312   ;;  %v857_v59 = vlaneseq (!%p3967_p0) }
  0xb5   : > { %365 = sbr.rel (%p3967_p0) target bundleno = 503 (0x1f7), region = 68  ;;  %v372_v1 = vld [vmem:[#allocation4 + $0x20] sm:$0xff] (!%p3967_p0)  ;;  %v373_v4 = vld [vmem:[#allocation4 + $0x28] sm:$0xff] (!%p3967_p0)  ;;  %551 = vmatprep.mubr.bf16.mxu0 (!%p3967_p0), %v3298_v8  ;;  %592 = vmatprep.mubr.bf16.mxu1 (!%p3967_p0), %v3298_v8  ;;  %v3582_v15 = vsel (!%p3967_p0), %vm492_vm0, 65535, %v3298_v8  ;;  %v374_v27 = vld [vmem:[#allocation4 + $0x30] sm:$0xff] (!%p3967_p0) }
  0xb6   : > { %v2505_v3 = vcombine.high (!%p3967_p0), %v368_v0, %v372_v1  ;;  %v2504_v5 = vcombine.low (!%p3967_p0), %v368_v0, %v372_v1  ;;  %v376_v6 = vld [vmem:[#allocation4 + $0x40] sm:$0xff] (!%p3967_p0)  ;;  %v2507_v9 = vcombine.high (!%p3967_p0), %v369_v2, %v373_v4  ;;  %v2506_v10 = vcombine.low (!%p3967_p0), %v369_v2, %v373_v4  ;;  %v377_v12 = vld [vmem:[#allocation4 + $0x48] sm:$0xff] (!%p3967_p0)  ;;  %v371_v28 = vld [vmem:[#allocation4 + $0x18] sm:$0xff] (!%p3967_p0) }
  0xb7   : > { %v380_v7 = vld [vmem:[#allocation4 + $0x60] sm:$0xff] (!%p3967_p0)  ;;  %v381_v13 = vld [vmem:[#allocation4 + $0x68] sm:$0xff] (!%p3967_p0)  ;;  %v375_v29 = vld [vmem:[#allocation4 + $0x38] sm:$0xff] (!%p3967_p0)  ;;  %v2509_v33 = vcombine.high (!%p3967_p0), %v370_v26, %v374_v27  ;;  %v2508_v42 = vcombine.low (!%p3967_p0), %v370_v26, %v374_v27  ;;  %v3299_v57 = vmov (!%p3967_p0), 1966171168   ;;  %v3601_v61 = vshrl.u32 (!%p3967_p0), %v857_v59, 7 }
  0xb8   : > { %v2513_v11 = vcombine.high (!%p3967_p0), %v376_v6, %v380_v7  ;;  %v384_v14 = vld [vmem:[#allocation4 + $0x80] sm:$0x11] (!%p3967_p0)  ;;  %519 = vmatprep.subr.bf16.mxu0 (!%p3967_p0), %v2505_v3  ;;  %v2515_v16 = vcombine.high (!%p3967_p0), %v377_v12, %v381_v13  ;;  %v385_v18 = vld [vmem:[#allocation4 + $0x88] sm:$0x11] (!%p3967_p0)  ;;  %560 = vmatprep.subr.bf16.mxu1 (!%p3967_p0), %v2507_v9  ;;  %v2512_v19 = vcombine.low (!%p3967_p0), %v376_v6, %v380_v7  ;;  %v366_v31 = vld [vmem:[%s3919_s0] sm:$0xff] (!%p3967_p0)  ;;  %v855_v58 = vunpack.c.l.s4 (!%p3967_p0), %v3299_v57 }
  0xb9   : > { %v2521_v17 = vcombine.high (!%p3967_p0), %v384_v14, %v384_v14  ;;  %520 = vmatpush1.bf16.msra.mxu0 (!%p3967_p0), %v2504_v5  ;;  %v2523_v20 = vcombine.high (!%p3967_p0), %v385_v18, %v385_v18  ;;  %v2520_v21 = vcombine.low (!%p3967_p0), %v384_v14, %v384_v14  ;;  %561 = vmatpush1.bf16.msra.mxu1 (!%p3967_p0), %v2506_v10  ;;  %v378_v35 = vld [vmem:[#allocation4 + $0x50] sm:$0xff] (!%p3967_p0)  ;;  %v379_v39 = vld [vmem:[#allocation4 + $0x58] sm:$0xff] (!%p3967_p0)  ;;  %v1110_v56 = vld [vmem:[#allocation10 + $0x2] ss:$0 sm:$0xff] (!%p3967_p0) }
  0xba   : > { %521 = vmatprep.subr.bf16.mxu0 (!%p3967_p0), %v2513_v11  ;;  %v2514_v22 = vcombine.low (!%p3967_p0), %v377_v12, %v381_v13  ;;  %v2522_v24 = vcombine.low (!%p3967_p0), %v385_v18, %v385_v18  ;;  %562 = vmatprep.subr.bf16.mxu1 (!%p3967_p0), %v2515_v16  ;;  %v2511_v34 = vcombine.high (!%p3967_p0), %v371_v28, %v375_v29  ;;  %v382_v36 = vld [vmem:[#allocation4 + $0x70] sm:$0xff] (!%p3967_p0)  ;;  %v383_v40 = vld [vmem:[#allocation4 + $0x78] sm:$0xff] (!%p3967_p0)  ;;  %v856_v60 = vunpack.c.0.s8 (!%p3967_p0), %v855_v58 }
  0xbb   : > { %v499_v23 = vand.u32 (!%p3967_p0), %v2521_v17, %v3582_v15  ;;  %v505_v25 = vand.u32 (!%p3967_p0), %v2523_v20, %v3582_v15  ;;  %v496_v30 = vand.u32 (!%p3967_p0), %v2520_v21, %v3582_v15  ;;  %v386_v37 = vld [vmem:[#allocation4 + $0x90] sm:$0x11] (!%p3967_p0)  ;;  %v367_v38 = vpack.c.bf16 (!%p3967_p0), %v366_v31, %v366_v31  ;;  %v387_v41 = vld [vmem:[#allocation4 + $0x98] sm:$0x11] (!%p3967_p0)  ;;  %1111 = vst [vmem:[#allocation3] sm:$0xff] (!%p3967_p0), %v1110_v56 }
  0xbc   : > { %v502_v32 = vand.u32 %v2522_v24, %v3582_v15  ;;  %v2510_v43 = vcombine.low %v371_v28, %v375_v29  ;;  %v2517_v44 = vcombine.high %v378_v35, %v382_v36  ;;  %v2525_v45 = vcombine.high %v386_v37, %v386_v37 }
  0xbd   : > { %522 = vmatpush1.bf16.msra.mxu0 %v2512_v19  ;;  %563 = vmatpush1.bf16.msra.mxu1 %v2514_v22  ;;  %v2519_v46 = vcombine.high %v379_v39, %v383_v40  ;;  %v2527_v47 = vcombine.high %v387_v41, %v387_v41  ;;  %v2516_v48 = vcombine.low %v378_v35, %v382_v36 }
  0xbe   : > { %523 = vmatprep.subr.bf16.mxu0 %v499_v23  ;;  %564 = vmatprep.subr.bf16.mxu1 %v505_v25  ;;  %v2524_v49 = vcombine.low %v386_v37, %v386_v37  ;;  %v2518_v50 = vcombine.low %v379_v39, %v383_v40  ;;  %v511_v51 = vand.u32 %v2525_v45, %v3582_v15 }
  0xbf   : > { %v2526_v52 = vcombine.low %v387_v41, %v387_v41  ;;  %v517_v53 = vand.u32 %v2527_v47, %v3582_v15  ;;  %v3613_v3 = vsub.s32 %v856_v60, %v3601_v61 }
  0xc0   : > { %v508_v54 = vand.u32 %v2524_v49, %v3582_v15 }
  0xc1   : > { %524 = vmatpush1.bf16.msra.mxu0 %v496_v30  ;;  %565 = vmatpush1.bf16.msra.mxu1 %v502_v32  ;;  %v514_v55 = vand.u32 %v2526_v52, %v3582_v15 }
  0xc2   : > { %601 = vmatprep.subr.bf16.mxu0 %v2509_v33  ;;  %642 = vmatprep.subr.bf16.mxu1 %v2511_v34 }
  0xc4   : > { %2528 = vmatmul.mubr.msk.bf16.vlgmr.msra.gmra.mrb[0].mxu0 %vm488_vm1, %v367_v38  ;;  %2529 = vmatmul.mubr.msk.bf16.vlgmr.msra.gmra.mrb[0].mxu1 %vm488_vm1, %v367_v38 }
  0xc5   : > { %602 = vmatpush1.bf16.msra.mxu0 %v2508_v42  ;;  %643 = vmatpush1.bf16.msra.mxu1 %v2510_v43 }
  0xc6   : > { %603 = vmatprep.subr.bf16.mxu0 %v2517_v44  ;;  %644 = vmatprep.subr.bf16.mxu1 %v2519_v46 }
  0xc7   : > { %633 = vmatprep.mubr.bf16.mxu0 %v3298_v8  ;;  %674 = vmatprep.mubr.bf16.mxu1 %v3298_v8 }
  0xc9   : > { %604 = vmatpush1.bf16.msra.mxu0 %v2516_v48  ;;  %645 = vmatpush1.bf16.msra.mxu1 %v2518_v50 }
  0xca   : > { %605 = vmatprep.subr.bf16.mxu0 %v511_v51  ;;  %646 = vmatprep.subr.bf16.mxu1 %v517_v53 }
  0xcd   : > { %606 = vmatpush1.bf16.msra.mxu0 %v508_v54  ;;  %647 = vmatpush1.bf16.msra.mxu1 %v514_v55 }
  0xd0   : > { %2530 = vmatmul.mubr.msk.bf16.vlgmr.msra.gmra.mrb[4].mxu0 %vm488_vm1, %v367_v38  ;;  %2531 = vmatmul.mubr.msk.bf16.vlgmr.msra.gmra.mrb[4].mxu1 %vm488_vm1, %v367_v38 }
 0x197   : > { %v3603_v62 = vpop.f32.mrb[0].mxu0  ;;  %v3608_v1 = vpop.f32.mrb[0].mxu1 }
 0x198   : > { %v690_v63 = vrot.slane %v3603_v62, 4  ;;  %v738_v0 = vmul.f32 %v3603_v62, %v3603_v62  ;;  %v3610_v2 = vpop.f32.mrb[1].mxu0  ;;  %v702_v4 = vrot.slane %v3608_v1, 4  ;;  %v740_v5 = vmul.f32 %v3608_v1, %v3608_v1  ;;  %v3621_v8 = vpop.f32.mrb[1].mxu1 }
 0x199   : > { %v696_v6 = vrot.slane %v3610_v2, 4  ;;  %v739_v7 = vmul.f32 %v3610_v2, %v3610_v2  ;;  %v557_v9 = vpop.f32.mrb[2].mxu0  ;;  %v708_v12 = vrot.slane %v3621_v8, 4  ;;  %v741_v13 = vmul.f32 %v3621_v8, %v3621_v8  ;;  %v598_v14 = vpop.f32.mrb[2].mxu1 }
 0x19a   : > { %v691_v10 = vadd.f32 %v690_v63, %v3603_v62  ;;  %v746_v11 = vrot.slane %v738_v0, 4  ;;  %v558_v15 = vpop.f32.mrb[3].mxu0  ;;  %v703_v16 = vadd.f32 %v702_v4, %v3608_v1  ;;  %v758_v17 = vrot.slane %v740_v5, 4  ;;  %v599_v20 = vpop.f32.mrb[3].mxu1 }
 0x19b   : > { %v697_v18 = vadd.f32 %v696_v6, %v3610_v2  ;;  %v752_v19 = vrot.slane %v739_v7, 4  ;;  %v709_v23 = vadd.f32 %v708_v12, %v3621_v8  ;;  %v764_v24 = vrot.slane %v741_v13, 4 }
 0x19c   : > { %v692_v21 = vrot.slane %v691_v10, 2  ;;  %v747_v22 = vadd.f32 %v746_v11, %v738_v0  ;;  %v704_v25 = vrot.slane %v703_v16, 2  ;;  %v759_v26 = vadd.f32 %v758_v17, %v740_v5 }
 0x19d   : > { %v698_v27 = vrot.slane %v697_v18, 2  ;;  %v753_v28 = vadd.f32 %v752_v19, %v739_v7  ;;  %v710_v31 = vrot.slane %v709_v23, 2  ;;  %v765_v32 = vadd.f32 %v764_v24, %v741_v13 }
 0x19e   : > { %v693_v29 = vadd.f32 %v692_v21, %v691_v10  ;;  %v748_v30 = vrot.slane %v747_v22, 2  ;;  %v705_v33 = vadd.f32 %v704_v25, %v703_v16  ;;  %v760_v34 = vrot.slane %v759_v26, 2 }
 0x19f   : > { %v699_v35 = vadd.f32 %v698_v27, %v697_v18  ;;  %v754_v36 = vrot.slane %v753_v28, 2  ;;  %v711_v39 = vadd.f32 %v710_v31, %v709_v23  ;;  %v766_v40 = vrot.slane %v765_v32, 2 }
 0x1a0   : > { %v694_v37 = vrot.slane %v693_v29, 1  ;;  %v749_v38 = vadd.f32 %v748_v30, %v747_v22  ;;  %v706_v41 = vrot.slane %v705_v33, 1  ;;  %v761_v42 = vadd.f32 %v760_v34, %v759_v26 }
 0x1a1   : > { %v700_v43 = vrot.slane %v699_v35, 1  ;;  %v755_v44 = vadd.f32 %v754_v36, %v753_v28  ;;  %v712_v47 = vrot.slane %v711_v39, 1  ;;  %v767_v48 = vadd.f32 %v766_v40, %v765_v32 }
 0x1a2   : > { %v695_v45 = vadd.f32 %v694_v37, %v693_v29  ;;  %v750_v46 = vrot.slane %v749_v38, 1  ;;  %v707_v49 = vadd.f32 %v706_v41, %v705_v33  ;;  %v762_v50 = vrot.slane %v761_v42, 1 }
 0x1a3   : > { %v701_v51 = vadd.f32 %v700_v43, %v699_v35  ;;  %v756_v52 = vrot.slane %v755_v44, 1  ;;  %v3630_v53 = vpop.f32.mrb[4].mxu0  ;;  %v713_v56 = vadd.f32 %v712_v47, %v711_v39  ;;  %v768_v57 = vrot.slane %v767_v48, 1  ;;  %v3634_v58 = vpop.f32.mrb[4].mxu1 }
 0x1a4   : > { %v751_v54 = vadd.f32 %v750_v46, %v749_v38  ;;  %v3632_v55 = vmul.f32 0.125, %v695_v45  ;;  %v3636_v59 = vpop.f32.mrb[5].mxu0  ;;  %v763_v60 = vadd.f32 %v762_v50, %v761_v42  ;;  %v3638_v63 = vmul.f32 0.125, %v707_v49  ;;  %v3642_v5 = vpop.f32.mrb[5].mxu1 }
 0x1a5   : > { %v757_v0 = vadd.f32 %v756_v52, %v755_v44  ;;  %v3640_v4 = vmul.f32 0.125, %v701_v51  ;;  %v639_v6 = vpop.f32.mrb[6].mxu0  ;;  %v769_v10 = vadd.f32 %v768_v57, %v767_v48  ;;  %v3646_v11 = vmul.f32 0.125, %v713_v56  ;;  %v680_v12 = vpop.f32.mrb[6].mxu1 }
 0x1a6   : > { %v802_v7 = vmul.f32 0.125, %v751_v54  ;;  %v810_v9 = vmul.f32 %v3632_v55, %v3632_v55  ;;  %v640_v13 = vpop.f32.mrb[7].mxu0  ;;  %v804_v14 = vmul.f32 0.125, %v763_v60  ;;  %v812_v15 = vmul.f32 %v3638_v63, %v3638_v63  ;;  %v681_v18 = vpop.f32.mrb[7].mxu1 }
 0x1a7   : > { %v803_v16 = vmul.f32 0.125, %v757_v0  ;;  %v811_v17 = vmul.f32 %v3640_v4, %v3640_v4  ;;  %v805_v20 = vmul.f32 0.125, %v769_v10  ;;  %v813_v21 = vmul.f32 %v3646_v11, %v3646_v11 }
 0x1a8   : > { %v818_v19 = vsub.f32 %v802_v7, %v810_v9  ;;  %v714_v22 = vrot.slane %v3630_v53, 4  ;;  %v820_v23 = vsub.f32 %v804_v14, %v812_v15  ;;  %v742_v25 = vmul.f32 %v3630_v53, %v3630_v53 }
 0x1a9   : > { %v819_v24 = vsub.f32 %v803_v16, %v811_v17  ;;  %v726_v26 = vrot.slane %v3634_v58, 4  ;;  %v821_v28 = vsub.f32 %v805_v20, %v813_v21  ;;  %v744_v30 = vmul.f32 %v3634_v58, %v3634_v58 }
 0x1aa   : > { %v826_v27 = vadd.f32 1e-05, %v818_v19  ;;  %v715_v29 = vadd.f32 %v714_v22, %v3630_v53  ;;  %v828_v31 = vadd.f32 1e-05, %v820_v23  ;;  %v770_v33 = vrot.slane %v742_v25, 4 }
 0x1ab   : > { %v827_v32 = vadd.f32 1e-05, %v819_v24  ;;  %v727_v34 = vadd.f32 %v726_v26, %v3634_v58  ;;  %v829_v35 = vadd.f32 1e-05, %v821_v28  ;;  %v782_v37 = vrot.slane %v744_v30, 4 }
 0x1ac   : > { %2827 = vrsqrt.f32 %v826_v27  ;;  %v716_v36 = vrot.slane %v715_v29, 2  ;;  %v771_v38 = vadd.f32 %v770_v33, %v742_v25  ;;  %v720_v40 = vrot.slane %v3636_v59, 4 }
 0x1ad   : > { %2829 = vrsqrt.f32 %v828_v31  ;;  %v728_v39 = vrot.slane %v727_v34, 2  ;;  %v783_v42 = vadd.f32 %v782_v37, %v744_v30  ;;  %v743_v43 = vmul.f32 %v3636_v59, %v3636_v59 }
 0x1ae   : > { %2831 = vrsqrt.f32 %v827_v32  ;;  %v717_v41 = vadd.f32 %v716_v36, %v715_v29  ;;  %v772_v44 = vrot.slane %v771_v38, 2  ;;  %v721_v46 = vadd.f32 %v720_v40, %v3636_v59 }
 0x1af   : > { %2833 = vrsqrt.f32 %v829_v35  ;;  %v729_v45 = vadd.f32 %v728_v39, %v727_v34  ;;  %v784_v48 = vrot.slane %v783_v42, 2  ;;  %v776_v49 = vrot.slane %v743_v43, 4 }
 0x1b0   : > { %v718_v47 = vrot.slane %v717_v41, 1  ;;  %v732_v50 = vrot.slane %v3642_v5, 4  ;;  %v773_v51 = vadd.f32 %v772_v44, %v771_v38  ;;  %v722_v54 = vrot.slane %v721_v46, 2 }
 0x1b1   : > { %v730_v52 = vrot.slane %v729_v45, 1  ;;  %v745_v56 = vmul.f32 %v3642_v5, %v3642_v5  ;;  %v785_v60 = vadd.f32 %v784_v48, %v783_v42  ;;  %v777_v0 = vadd.f32 %v776_v49, %v743_v43 }
 0x1b2   : > { %v719_v57 = vadd.f32 %v718_v47, %v717_v41  ;;  %v733_v6 = vadd.f32 %v732_v50, %v3642_v5  ;;  %v774_v7 = vrot.slane %v773_v51, 1  ;;  %v723_v10 = vadd.f32 %v722_v54, %v721_v46 }
 0x1b3   : > { %v731_v9 = vadd.f32 %v730_v52, %v729_v45  ;;  %v788_v12 = vrot.slane %v745_v56, 4  ;;  %v786_v14 = vrot.slane %v785_v60, 1  ;;  %v778_v15 = vrot.slane %v777_v0, 2 }
 0x1b4   : > { %v3670_v13 = vmul.f32 0.125, %v719_v57  ;;  %v734_v16 = vrot.slane %v733_v6, 2  ;;  %v775_v17 = vadd.f32 %v774_v7, %v773_v51  ;;  %v724_v19 = vrot.slane %v723_v10, 1 }
 0x1b5   : > { %v3672_v18 = vmul.f32 0.125, %v731_v9  ;;  %v789_v20 = vadd.f32 %v788_v12, %v745_v56  ;;  %v787_v23 = vadd.f32 %v786_v14, %v785_v60  ;;  %v779_v24 = vadd.f32 %v778_v15, %v777_v0 }
 0x1b6   : > { %v2828_v21 = vpop.eup %2827  ;;  %v814_v22 = vmul.f32 %v3670_v13, %v3670_v13  ;;  %v735_v25 = vadd.f32 %v734_v16, %v733_v6  ;;  %v806_v27 = vmul.f32 0.125, %v775_v17  ;;  %v725_v29 = vadd.f32 %v724_v19, %v723_v10 }
 0x1b7   : > { %v2830_v26 = vpop.eup %2829  ;;  %v816_v28 = vmul.f32 %v3672_v18, %v3672_v18  ;;  %v790_v30 = vrot.slane %v789_v20, 2  ;;  %v808_v32 = vmul.f32 0.125, %v787_v23  ;;  %v780_v33 = vrot.slane %v779_v24, 1 }
 0x1b8   : > { %v2832_v31 = vpop.eup %2831  ;;  %v736_v34 = vrot.slane %v735_v25, 1  ;;  %v822_v37 = vsub.f32 %v806_v27, %v814_v22  ;;  %v3678_v38 = vmul.f32 0.125, %v725_v29  ;;  %v912_v29 = vsub.s32 2, %v3601_v61 }
 0x1b9   : > { %v2834_v35 = vpop.eup %2833  ;;  %v850_v36 = vcombine.low %v2828_v21, %v2832_v31  ;;  %v791_v39 = vadd.f32 %v790_v30, %v789_v20  ;;  %v781_v41 = vadd.f32 %v780_v33, %v779_v24  ;;  %v824_v44 = vsub.f32 %v808_v32, %v816_v28  ;;  %v683_v20 = vld [vmem:[#allocation10] ss:$8 sm:$0xf] }
 0x1ba   : > { %v851_v40 = vcombine.low %v2830_v26, %v2834_v35  ;;  %v737_v42 = vadd.f32 %v736_v34, %v735_v25  ;;  %v815_v45 = vmul.f32 %v3678_v38, %v3678_v38  ;;  %v830_v48 = vadd.f32 1e-05, %v822_v37  ;;  %v684_v21 = vld [vmem:[#allocation10] ss:$8 sm:$0xf0] }
 0x1bb   : > { %v860_v43 = vrot.slane %v850_v36, %v3613_v3  ;;  %v792_v46 = vrot.slane %v791_v39, 1  ;;  %v807_v49 = vmul.f32 0.125, %v781_v41  ;;  %v832_v57 = vadd.f32 1e-05, %v824_v44 }
 0x1bc   : > { %v867_v47 = vrot.slane %v851_v40, %v3613_v3  ;;  %v801_v50 = vmul.f32 0.125, %v737_v42  ;;  %2835 = vrsqrt.f32 %v830_v48  ;;  %v685_v24 = vor.u32 %v684_v21, %v683_v20 }
 0x1bd   : > { %v793_v51 = vadd.f32 %v792_v46, %v791_v39  ;;  %v823_v54 = vsub.f32 %v807_v49, %v815_v45  ;;  %v904_v26 = vsub.s32 0, %v3601_v61  ;;  %v908_v28 = vsub.s32 1, %v3601_v61 }
 0x1be   : > { %v882_v52 = vcombine.low %v860_v43, %v867_v47  ;;  %v817_v56 = vmul.f32 %v801_v50, %v801_v50  ;;  %v916_v30 = vsub.s32 3, %v3601_v61  ;;  %v920_v31 = vsub.s32 4, %v3601_v61 }
 0x1bf   : > { %v809_v60 = vmul.f32 0.125, %v793_v51  ;;  %v831_v0 = vadd.f32 1e-05, %v823_v54  ;;  %v924_v32 = vsub.s32 5, %v3601_v61  ;;  %v928_v33 = vsub.s32 6, %v3601_v61 }
 0x1c0   : > { %v890_v23 = vrot.slane %v882_v52, %v3613_v3  ;;  %v932_v34 = vsub.s32 7, %v3601_v61 }
 0x1c1   : > { %v825_v6 = vsub.f32 %v809_v60, %v817_v56  ;;  %2837 = vrsqrt.f32 %v831_v0 }
 0x1c2   : > { %2839 = vrsqrt.f32 %v832_v57 }
 0x1c3   : > { %v833_v7 = vadd.f32 1e-05, %v825_v6 }
 0x1c5   : > { %2841 = vrsqrt.f32 %v833_v7  ;;  %v687_v7 = vld [vmem:[#allocation10 + $0x1] ss:$8 sm:$0xf] }
 0x1c6   : > { %v2836_v9 = vpop.eup %2835 }
 0x1cb   : > { %v2838_v10 = vpop.eup %2837 }
 0x1cc   : > { %v2840_v12 = vpop.eup %2839  ;;  %v852_v14 = vcombine.low %v2836_v9, %v2838_v10 }
 0x1ce   : > { %v874_v16 = vrot.slane %v852_v14, %v3613_v3 }
 0x1cf   : > { %v2842_v15 = vpop.eup %2841 }
 0x1d0   : > { %v853_v17 = vcombine.low %v2840_v12, %v2842_v15 }
 0x1d2   : > { %v881_v19 = vrot.slane %v853_v17, %v3613_v3 }
 0x1d4   : > { %v883_v22 = vcombine.low %v874_v16, %v881_v19 }
 0x1d6   : > { %v897_v25 = vrot.slane %v883_v22, %v3613_v3 }
 0x1d8   : > { %v898_v27 = vcombine.low %v890_v23, %v897_v25 }
 0x1da   : > { %v900_v35 = vmul.f32 %v898_v27, %v685_v24 }
 0x1dc   : > { %v905_v36 = vrot.slane %v900_v35, %v904_v26  ;;  %v909_v37 = vrot.slane %v900_v35, %v908_v28  ;;  %v913_v39 = vrot.slane %v900_v35, %v912_v29  ;;  %v917_v40 = vrot.slane %v900_v35, %v916_v30 }
 0x1dd   : > { %v921_v41 = vrot.slane %v900_v35, %v920_v31  ;;  %v925_v42 = vrot.slane %v900_v35, %v924_v32  ;;  %v929_v43 = vrot.slane %v900_v35, %v928_v33  ;;  %v933_v44 = vrot.slane %v900_v35, %v932_v34 }
 0x1de   : > { %v942_v45 = vmul.f32 %v905_v36, %v3632_v55  ;;  %v943_v46 = vmul.f32 %v909_v37, %v3640_v4  ;;  %v944_v47 = vmul.f32 %v913_v39, %v3638_v63  ;;  %v945_v48 = vmul.f32 %v917_v40, %v3646_v11 }
 0x1df   : > { %v946_v49 = vmul.f32 %v921_v41, %v3670_v13  ;;  %v947_v61 = vmul.f32 %v925_v42, %v3678_v38  ;;  %v948_v51 = vmul.f32 %v929_v43, %v3672_v18  ;;  %v949_v52 = vmul.f32 %v933_v44, %v801_v50 }
 0x1e0   : > { %v958_v54 = vcombine.low %v942_v45, %v943_v46  ;;  %v959_v56 = vcombine.low %v944_v47, %v945_v48  ;;  %v1009_v57 = vmul.f32 %v905_v36, %v3603_v62  ;;  %v1010_v60 = vmul.f32 %v909_v37, %v3610_v2 }
 0x1e1   : > { %v960_v55 = vcombine.low %v946_v49, %v947_v61  ;;  %v961_v0 = vcombine.low %v948_v51, %v949_v52  ;;  %v1011_v4 = vmul.f32 %v913_v39, %v3608_v1  ;;  %v1012_v63 = vmul.f32 %v917_v40, %v3621_v8  ;;  %v688_v1 = vld [vmem:[#allocation10 + $0x1] ss:$8 sm:$0xf0] }
 0x1e2   : > { %v968_v11 = vrot.slane %v958_v54, %v3613_v3  ;;  %v975_v13 = vrot.slane %v959_v56, %v3613_v3  ;;  %v1013_v38 = vmul.f32 %v921_v41, %v3630_v53  ;;  %v1014_v18 = vmul.f32 %v925_v42, %v3636_v59 }
 0x1e3   : > { %v982_v50 = vrot.slane %v960_v55, %v3613_v3  ;;  %v989_v62 = vrot.slane %v961_v0, %v3613_v3  ;;  %v1015_v2 = vmul.f32 %v929_v43, %v3634_v58  ;;  %v1016_v6 = vmul.f32 %v933_v44, %v3642_v5 }
 0x1e4   : > { %v990_v9 = vcombine.low %v968_v11, %v975_v13  ;;  %v689_v12 = vor.u32 %v688_v1, %v687_v7 }
 0x1e5   : > { %v991_v8 = vcombine.low %v982_v50, %v989_v62 }
 0x1e6   : > { %v998_v10 = vrot.slane %v990_v9, %v3613_v3 }
 0x1e7   : > { %v1005_v14 = vrot.slane %v991_v8, %v3613_v3 }
 0x1e9   : > { %v1006_v53 = vcombine.low %v998_v10, %v1005_v14 }
 0x1eb   : > { %v1008_v15 = vsub.f32 %v689_v12, %v1006_v53 }
 0x1ed   : > { %v1021_v59 = vrot.slane %v1008_v15, %v904_v26  ;;  %v1025_v16 = vrot.slane %v1008_v15, %v908_v28  ;;  %v1029_v17 = vrot.slane %v1008_v15, %v912_v29  ;;  %v1033_v19 = vrot.slane %v1008_v15, %v916_v30 }
 0x1ee   : > { %v1037_v20 = vrot.slane %v1008_v15, %v920_v31  ;;  %v1041_v21 = vrot.slane %v1008_v15, %v924_v32  ;;  %v1045_v58 = vrot.slane %v1008_v15, %v928_v33  ;;  %v1049_v22 = vrot.slane %v1008_v15, %v932_v34 }
 0x1ef   : > { %v1058_v5 = vadd.f32 %v1021_v59, %v1009_v57  ;;  %v1059_v23 = vadd.f32 %v1025_v16, %v1010_v60  ;;  %v1060_v24 = vadd.f32 %v1029_v17, %v1011_v4  ;;  %v1061_v25 = vadd.f32 %v1033_v19, %v1012_v63 }
 0x1f0   : > { %v1062_v27 = vadd.f32 %v1037_v20, %v1013_v38  ;;  %v1063_v35 = vadd.f32 %v1041_v21, %v1014_v18  ;;  %v1064_v36 = vadd.f32 %v1045_v58, %v1015_v2  ;;  %v1065_v37 = vadd.f32 %v1049_v22, %v1016_v6 }
 0x1f1   : > { %v1066_v39 = vmax.f32 %v1058_v5, 0.0  ;;  %v1067_v3 = vmax.f32 %v1059_v23, 0.0  ;;  %v1068_v40 = vmax.f32 %v1060_v24, 0.0  ;;  %v1069_v41 = vmax.f32 %v1061_v25, 0.0 }
 0x1f2   : > { %v1070_v26 = vmax.f32 %v1062_v27, 0.0  ;;  %v1071_v28 = vmax.f32 %v1063_v35, 0.0  ;;  %v1072_v29 = vmax.f32 %v1064_v36, 0.0  ;;  %v1073_v30 = vmax.f32 %v1065_v37, 0.0 }
 0x1f3   : > { %v2697_v31 = vpack.c.bf16 %v1067_v3, %v1066_v39  ;;  %v2698_v32 = vpack.c.bf16 %v1069_v41, %v1068_v40 }
 0x1f4   : > { %v2699_v33 = vpack.c.bf16 %v1071_v28, %v1070_v26  ;;  %v2700_v34 = vpack.c.bf16 %v1073_v30, %v1072_v29 }
 0x1f5   : > { %1106 = vst [vmem:[#allocation2] sm:$0xff] %v2697_v31  ;;  %1107 = vst [vmem:[#allocation2 + $0x8] sm:$0xff] %v2698_v32 }
 0x1f6   : > { %1108 = vst [vmem:[#allocation2 + $0x10] sm:$0xff] %v2699_v33  ;;  %1109 = vst [vmem:[#allocation2 + $0x18] sm:$0xff] %v2700_v34 }
 0x1f7 PF: > { %v2843_v42 = vld [vmem:[%s3559_s20 + $0x4] ss:$8 sps:$4 sm:$0xff]   ;;  %v2847_v44 = vld [vmem:[%s3559_s20] ss:$8 sps:$4 sm:$0xff]   ;;  %v2849_v46 = vld [vmem:[%s3559_s20 + $0x14] ss:$8 sps:$4 sm:$0xff]  }
 0x1f8   : > { %v2845_v43 = vld [vmem:[%s3559_s20 + $0x204] ss:$8 sps:$4 sm:$0xff]   ;;  %1912 = vmatprep.subr.bf16.mxu1 %v2843_v42  ;;  %v2848_v45 = vld [vmem:[%s3559_s20 + $0x200] ss:$8 sps:$4 sm:$0xff]   ;;  %v2851_v47 = vld [vmem:[%s3559_s20 + $0x214] ss:$8 sps:$4 sm:$0xff]  }
 0x1f9   : > { %1994 = vmatprep.subr.bf16.mxu0 %v2845_v43  ;;  %1913 = vmatpush1.bf16.msra.mxu1 %v2847_v44  ;;  %v2853_v48 = vld [vmem:[%s3559_s20 + $0x10] ss:$8 sps:$4 sm:$0xff]   ;;  %v2855_v61 = vld [vmem:[%s3559_s20 + $0x24] ss:$8 sps:$4 sm:$0xff]   ;;  %v2859_v52 = vld [vmem:[%s3559_s20 + $0x20] ss:$8 sps:$4 sm:$0xff]  }
 0x1fa   : > { %1995 = vmatpush1.bf16.msra.mxu0 %v2848_v45  ;;  %1914 = vmatprep.subr.bf16.mxu1 %v2849_v46  ;;  %v2854_v49 = vld [vmem:[%s3559_s20 + $0x210] ss:$8 sps:$4 sm:$0xff]   ;;  %v2857_v51 = vld [vmem:[%s3559_s20 + $0x224] ss:$8 sps:$4 sm:$0xff]   ;;  %v2860_v54 = vld [vmem:[%s3559_s20 + $0x220] ss:$8 sps:$4 sm:$0xff]  }
 0x1fb   : > { %1996 = vmatprep.subr.bf16.mxu0 %v2851_v47  ;;  %v2861_v56 = vld [vmem:[%s3559_s20 + $0x34] ss:$8 sps:$4 sm:$0xff]   ;;  %v2865_v60 = vld [vmem:[%s3559_s20 + $0x30] ss:$8 sps:$4 sm:$0xff]   ;;  %v2867_v0 = vld [vmem:[%s3559_s20 + $0x44] ss:$8 sps:$4 sm:$0xff]  }
 0x1fc   : > { %v2863_v57 = vld [vmem:[%s3559_s20 + $0x234] ss:$8 sps:$4 sm:$0xff]   ;;  %v2866_v55 = vld [vmem:[%s3559_s20 + $0x230] ss:$8 sps:$4 sm:$0xff]   ;;  %v2869_v4 = vld [vmem:[%s3559_s20 + $0x244] ss:$8 sps:$4 sm:$0xff]  }
 0x1fd   : > { %1915 = vmatpush1.bf16.msra.mxu1 %v2853_v48  ;;  %v2871_v63 = vld [vmem:[%s3559_s20 + $0x40] ss:$8 sps:$4 sm:$0xff]   ;;  %v2873_v13 = vld [vmem:[%s3559_s20 + $0x54] ss:$8 sps:$4 sm:$0xff]   ;;  %v2877_v18 = vld [vmem:[%s3559_s20 + $0x50] ss:$8 sps:$4 sm:$0xff]  }
 0x1fe   : > { %1997 = vmatpush1.bf16.msra.mxu0 %v2854_v49  ;;  %1916 = vmatprep.subr.bf16.mxu1 %v2855_v61  ;;  %v2872_v11 = vld [vmem:[%s3559_s20 + $0x240] ss:$8 sps:$4 sm:$0xff]   ;;  %v2875_v38 = vld [vmem:[%s3559_s20 + $0x254] ss:$8 sps:$4 sm:$0xff]   ;;  %v2878_v50 = vld [vmem:[%s3559_s20 + $0x250] ss:$8 sps:$4 sm:$0xff]  }
 0x1ff   : > { %1998 = vmatprep.subr.bf16.mxu0 %v2857_v51  ;;  %v2879_v62 = vld [vmem:[%s3559_s20 + $0x64] ss:$8 sps:$4 sm:$0xff]   ;;  %v2883_v6 = vld [vmem:[%s3559_s20 + $0x60] ss:$8 sps:$4 sm:$0xff]   ;;  %v2885_v1 = vld [vmem:[%s3559_s20 + $0x74] ss:$8 sps:$4 sm:$0xff]  }
 0x200   : > { %v2881_v2 = vld [vmem:[%s3559_s20 + $0x264] ss:$8 sps:$4 sm:$0xff]   ;;  %v2884_v7 = vld [vmem:[%s3559_s20 + $0x260] ss:$8 sps:$4 sm:$0xff]   ;;  %v2887_v9 = vld [vmem:[%s3559_s20 + $0x274] ss:$8 sps:$4 sm:$0xff]  }
 0x201   : > { %1917 = vmatpush1.bf16.msra.mxu1 %v2859_v52  ;;  %v2889_v8 = vld [vmem:[%s3559_s20 + $0x70] ss:$8 sps:$4 sm:$0xff]   ;;  %v2891_v12 = vld [vmem:[%s3559_s20 + $0x84] ss:$8 sps:$4 sm:$0xff]   ;;  %v2895_v53 = vld [vmem:[%s3559_s20 + $0x80] ss:$8 sps:$4 sm:$0xff]  }
 0x202   : > { %1999 = vmatpush1.bf16.msra.mxu0 %v2860_v54  ;;  %1918 = vmatprep.subr.bf16.mxu1 %v2861_v56  ;;  %v2890_v10 = vld [vmem:[%s3559_s20 + $0x270] ss:$8 sps:$4 sm:$0xff]   ;;  %v2893_v14 = vld [vmem:[%s3559_s20 + $0x284] ss:$8 sps:$4 sm:$0xff]   ;;  %v2896_v15 = vld [vmem:[%s3559_s20 + $0x280] ss:$8 sps:$4 sm:$0xff]  }
 0x203   : > { %2000 = vmatprep.subr.bf16.mxu0 %v2863_v57  ;;  %v2897_v59 = vld [vmem:[%s3559_s20 + $0x94] ss:$8 sps:$4 sm:$0xff]   ;;  %v2901_v17 = vld [vmem:[%s3559_s20 + $0x90] ss:$8 sps:$4 sm:$0xff]   ;;  %v2903_v20 = vld [vmem:[%s3559_s20 + $0xa4] ss:$8 sps:$4 sm:$0xff]  }
 0x204   : > { %v2899_v16 = vld [vmem:[%s3559_s20 + $0x294] ss:$8 sps:$4 sm:$0xff]   ;;  %v2902_v19 = vld [vmem:[%s3559_s20 + $0x290] ss:$8 sps:$4 sm:$0xff]   ;;  %v2905_v21 = vld [vmem:[%s3559_s20 + $0x2a4] ss:$8 sps:$4 sm:$0xff]  }
 0x205   : > { %1919 = vmatpush1.bf16.msra.mxu1 %v2865_v60  ;;  %v2907_v58 = vld [vmem:[%s3559_s20 + $0xa0] ss:$8 sps:$4 sm:$0xff]   ;;  %v2909_v5 = vld [vmem:[%s3559_s20 + $0xb4] ss:$8 sps:$4 sm:$0xff]   ;;  %v2913_v25 = vld [vmem:[%s3559_s20 + $0xb0] ss:$8 sps:$4 sm:$0xff]  }
 0x206   : > { %2001 = vmatpush1.bf16.msra.mxu0 %v2866_v55  ;;  %1920 = vmatprep.subr.bf16.mxu1 %v2867_v0  ;;  %v2908_v22 = vld [vmem:[%s3559_s20 + $0x2a0] ss:$8 sps:$4 sm:$0xff]   ;;  %v2911_v23 = vld [vmem:[%s3559_s20 + $0x2b4] ss:$8 sps:$4 sm:$0xff]   ;;  %v2914_v35 = vld [vmem:[%s3559_s20 + $0x2b0] ss:$8 sps:$4 sm:$0xff]  }
 0x207   : > { %2002 = vmatprep.subr.bf16.mxu0 %v2869_v4  ;;  %v1112_v24 = vld [vmem:[#allocation2] sm:$0xff]  ;;  %v1114_v36 = vld [vmem:[#allocation2 + $0x10] sm:$0xff]  ;;  %p2689_p8 = scmp.ne.s32.totalorder %s3356_s25, 3 }
 0x208   : > { %v2537_v27 = vcombine.high %v1112_v24, %v1112_v24  ;;  %v2915_v37 = vld [vmem:[%s3559_s20 + $0xc4] ss:$8 sps:$4 sm:$0xff]   ;;  %v2541_v3 = vcombine.high %v1114_v36, %v1114_v36  ;;  %v2919_v40 = vld [vmem:[%s3559_s20 + $0xc0] ss:$8 sps:$4 sm:$0xff]   ;;  %v2921_v26 = vld [vmem:[%s3559_s20 + $0xd4] ss:$8 sps:$4 sm:$0xff]   ;;  %v2536_v48 = vcombine.low %v1112_v24, %v1112_v24  ;;  %v2540_v49 = vcombine.low %v1114_v36, %v1114_v36 }
 0x209   : > { %1921 = vmatpush1.bf16.msra.mxu1 %v2871_v63  ;;  %v2917_v39 = vld [vmem:[%s3559_s20 + $0x2c4] ss:$8 sps:$4 sm:$0xff]   ;;  %v2920_v41 = vld [vmem:[%s3559_s20 + $0x2c0] ss:$8 sps:$4 sm:$0xff]   ;;  %v2923_v28 = vld [vmem:[%s3559_s20 + $0x2d4] ss:$8 sps:$4 sm:$0xff]  }
 0x20a   : > { %2003 = vmatpush1.bf16.msra.mxu0 %v2872_v11  ;;  %1922 = vmatprep.subr.bf16.mxu1 %v2873_v13  ;;  %v2925_v29 = vld [vmem:[%s3559_s20 + $0xd0] ss:$8 sps:$4 sm:$0xff]   ;;  %v2927_v31 = vld [vmem:[%s3559_s20 + $0xe4] ss:$8 sps:$4 sm:$0xff]   ;;  %v2931_v33 = vld [vmem:[%s3559_s20 + $0xe0] ss:$8 sps:$4 sm:$0xff]  }
 0x20b   : > { %2004 = vmatprep.subr.bf16.mxu0 %v2875_v38  ;;  %1944 = vmatprep.mubr.bf16.mxu1 %v2537_v27  ;;  %v2926_v30 = vld [vmem:[%s3559_s20 + $0x2d0] ss:$8 sps:$4 sm:$0xff]   ;;  %v2929_v32 = vld [vmem:[%s3559_s20 + $0x2e4] ss:$8 sps:$4 sm:$0xff]   ;;  %v2932_v34 = vld [vmem:[%s3559_s20 + $0x2e0] ss:$8 sps:$4 sm:$0xff]  }
 0x20c   : > { %2026 = vmatprep.mubr.bf16.mxu0 %v2541_v3  ;;  %v2933_v42 = vld [vmem:[%s3559_s20 + $0xf4] ss:$8 sps:$4 sm:$0xff]   ;;  %v2937_v44 = vld [vmem:[%s3559_s20 + $0xf0] ss:$8 sps:$4 sm:$0xff]   ;;  %v2943_v46 = vld [vmem:[%s3559_s20 + $0x104] ss:$8 sps:$4 sm:$0xff]  }
 0x20d   : > { %1923 = vmatpush1.bf16.msra.mxu1 %v2877_v18  ;;  %v2935_v43 = vld [vmem:[%s3559_s20 + $0x2f4] ss:$8 sps:$4 sm:$0xff]   ;;  %v2938_v45 = vld [vmem:[%s3559_s20 + $0x2f0] ss:$8 sps:$4 sm:$0xff]   ;;  %v2948_v47 = vld [vmem:[%s3559_s20 + $0x304] ss:$8 sps:$4 sm:$0xff]  }
 0x20e   : > { %2005 = vmatpush1.bf16.msra.mxu0 %v2878_v50  ;;  %1924 = vmatprep.subr.bf16.mxu1 %v2879_v62  ;;  %v2941_v61 = vld [vmem:[%s3559_s20 + $0x100] ss:$8 sps:$4 sm:$0xff]   ;;  %v2951_v52 = vld [vmem:[%s3559_s20 + $0x114] ss:$8 sps:$4 sm:$0xff]   ;;  %v2949_v56 = vld [vmem:[%s3559_s20 + $0x110] ss:$8 sps:$4 sm:$0xff]  }
 0x20f   : > { %2006 = vmatprep.subr.bf16.mxu0 %v2881_v2  ;;  %v2946_v51 = vld [vmem:[%s3559_s20 + $0x300] ss:$8 sps:$4 sm:$0xff]   ;;  %v2954_v54 = vld [vmem:[%s3559_s20 + $0x314] ss:$8 sps:$4 sm:$0xff]   ;;  %v2952_v57 = vld [vmem:[%s3559_s20 + $0x310] ss:$8 sps:$4 sm:$0xff]  }
 0x210   : > { %v2957_v60 = vld [vmem:[%s3559_s20 + $0x124] ss:$8 sps:$4 sm:$0xff]   ;;  %v2955_v0 = vld [vmem:[%s3559_s20 + $0x120] ss:$8 sps:$4 sm:$0xff]   ;;  %v2963_v63 = vld [vmem:[%s3559_s20 + $0x134] ss:$8 sps:$4 sm:$0xff]  }
 0x211   : > { %1925 = vmatpush1.bf16.msra.mxu1 %v2883_v6  ;;  %v2960_v55 = vld [vmem:[%s3559_s20 + $0x324] ss:$8 sps:$4 sm:$0xff]   ;;  %v2958_v4 = vld [vmem:[%s3559_s20 + $0x320] ss:$8 sps:$4 sm:$0xff]   ;;  %v2966_v11 = vld [vmem:[%s3559_s20 + $0x334] ss:$8 sps:$4 sm:$0xff]  }
 0x212   : > { %2007 = vmatpush1.bf16.msra.mxu0 %v2884_v7  ;;  %1926 = vmatprep.subr.bf16.mxu1 %v2885_v1  ;;  %v2961_v13 = vld [vmem:[%s3559_s20 + $0x130] ss:$8 sps:$4 sm:$0xff]   ;;  %v2969_v18 = vld [vmem:[%s3559_s20 + $0x144] ss:$8 sps:$4 sm:$0xff]   ;;  %v2967_v62 = vld [vmem:[%s3559_s20 + $0x140] ss:$8 sps:$4 sm:$0xff]  }
 0x213   : > { %2008 = vmatprep.subr.bf16.mxu0 %v2887_v9  ;;  %v2964_v38 = vld [vmem:[%s3559_s20 + $0x330] ss:$8 sps:$4 sm:$0xff]   ;;  %v2972_v50 = vld [vmem:[%s3559_s20 + $0x344] ss:$8 sps:$4 sm:$0xff]   ;;  %v2970_v2 = vld [vmem:[%s3559_s20 + $0x340] ss:$8 sps:$4 sm:$0xff]  }
 0x214   : > { %v2975_v6 = vld [vmem:[%s3559_s20 + $0x154] ss:$8 sps:$4 sm:$0xff]   ;;  %v2973_v1 = vld [vmem:[%s3559_s20 + $0x150] ss:$8 sps:$4 sm:$0xff]   ;;  %v3005_v36 = vld [vmem:[%s3559_s20 + $0x1a4] ss:$8 sps:$4 sm:$0xff]  }
 0x215   : > { %1927 = vmatpush1.bf16.msra.mxu1 %v2889_v8  ;;  %v2978_v7 = vld [vmem:[%s3559_s20 + $0x354] ss:$8 sps:$4 sm:$0xff]   ;;  %v2976_v9 = vld [vmem:[%s3559_s20 + $0x350] ss:$8 sps:$4 sm:$0xff]   ;;  %v2981_v8 = vld [vmem:[%s3559_s20 + $0x164] ss:$8 sps:$4 sm:$0xff]  }
 0x216   : > { %2009 = vmatpush1.bf16.msra.mxu0 %v2890_v10  ;;  %1928 = vmatprep.subr.bf16.mxu1 %v2891_v12  ;;  %v2984_v10 = vld [vmem:[%s3559_s20 + $0x364] ss:$8 sps:$4 sm:$0xff]   ;;  %v2979_v12 = vld [vmem:[%s3559_s20 + $0x160] ss:$8 sps:$4 sm:$0xff]   ;;  %v2999_v24 = vld [vmem:[%s3559_s20 + $0x194] ss:$8 sps:$4 sm:$0xff]  }
 0x217   : > { %2010 = vmatprep.subr.bf16.mxu0 %v2893_v14  ;;  %v2982_v14 = vld [vmem:[%s3559_s20 + $0x360] ss:$8 sps:$4 sm:$0xff]   ;;  %v2997_v27 = vld [vmem:[%s3559_s20 + $0x190] ss:$8 sps:$4 sm:$0xff]  }
 0x218   : > { %v3006_v3 = vld [vmem:[%s3559_s20 + $0x3a0] ss:$8 sps:$4 sm:$0xff]  }
 0x219   : > { %1929 = vmatpush1.bf16.msra.mxu1 %v2895_v53  ;;  %v3809_v53 = vld [vmem:[#allocation2 + $0x8] sm:$0xff] }
 0x21a   : > { %2011 = vmatpush1.bf16.msra.mxu0 %v2896_v15  ;;  %1930 = vmatprep.subr.bf16.mxu1 %v2897_v59  ;;  %v3811_v15 = vld [vmem:[#allocation2 + $0x18] sm:$0xff] }
 0x21b   : > { %2012 = vmatprep.subr.bf16.mxu0 %v2899_v16  ;;  %v2987_v59 = vld [vmem:[%s3559_s20 + $0x174] ss:$8 sps:$4 sm:$0xff]  }
 0x21c   : > { %v2990_v16 = vld [vmem:[%s3559_s20 + $0x374] ss:$8 sps:$4 sm:$0xff]  }
 0x21d   : > { %1931 = vmatpush1.bf16.msra.mxu1 %v2901_v17  ;;  %v2539_v17 = vcombine.high %v3809_v53, %v3809_v53 }
 0x21e   : > { %2013 = vmatpush1.bf16.msra.mxu0 %v2902_v19  ;;  %1932 = vmatprep.subr.bf16.mxu1 %v2903_v20  ;;  %v2543_v19 = vcombine.high %v3811_v15, %v3811_v15  ;;  %v2985_v20 = vld [vmem:[%s3559_s20 + $0x170] ss:$8 sps:$4 sm:$0xff]  }
 0x21f   : > { %2014 = vmatprep.subr.bf16.mxu0 %v2905_v21  ;;  %v2988_v21 = vld [vmem:[%s3559_s20 + $0x370] ss:$8 sps:$4 sm:$0xff]  }
 0x221   : > { %1933 = vmatpush1.bf16.msra.mxu1 %v2907_v58  ;;  %v2993_v58 = vld [vmem:[%s3559_s20 + $0x184] ss:$8 sps:$4 sm:$0xff]  }
 0x222   : > { %2015 = vmatpush1.bf16.msra.mxu0 %v2908_v22  ;;  %1934 = vmatprep.subr.bf16.mxu1 %v2909_v5  ;;  %v2996_v22 = vld [vmem:[%s3559_s20 + $0x384] ss:$8 sps:$4 sm:$0xff]   ;;  %v2991_v5 = vld [vmem:[%s3559_s20 + $0x180] ss:$8 sps:$4 sm:$0xff]  }
 0x223   : > { %2016 = vmatprep.subr.bf16.mxu0 %v2911_v23  ;;  %v2994_v23 = vld [vmem:[%s3559_s20 + $0x380] ss:$8 sps:$4 sm:$0xff]  }
 0x225   : > { %1935 = vmatpush1.bf16.msra.mxu1 %v2913_v25  ;;  %v3002_v25 = vld [vmem:[%s3559_s20 + $0x394] ss:$8 sps:$4 sm:$0xff]  }
 0x226   : > { %2017 = vmatpush1.bf16.msra.mxu0 %v2914_v35  ;;  %1936 = vmatprep.subr.bf16.mxu1 %v2915_v37  ;;  %v3000_v35 = vld [vmem:[%s3559_s20 + $0x390] ss:$8 sps:$4 sm:$0xff]   ;;  %v3008_v37 = vld [vmem:[%s3559_s20 + $0x3a4] ss:$8 sps:$4 sm:$0xff]  }
 0x227   : > { %2018 = vmatprep.subr.bf16.mxu0 %v2917_v39  ;;  %v3003_v39 = vld [vmem:[%s3559_s20 + $0x1a0] ss:$8 sps:$4 sm:$0xff]  }
 0x229   : > { %1937 = vmatpush1.bf16.msra.mxu1 %v2919_v40  ;;  %v3011_v40 = vld [vmem:[%s3559_s20 + $0x1b4] ss:$8 sps:$4 sm:$0xff]  }
 0x22a   : > { %2019 = vmatpush1.bf16.msra.mxu0 %v2920_v41  ;;  %1938 = vmatprep.subr.bf16.mxu1 %v2921_v26  ;;  %v3014_v41 = vld [vmem:[%s3559_s20 + $0x3b4] ss:$8 sps:$4 sm:$0xff]   ;;  %v3009_v26 = vld [vmem:[%s3559_s20 + $0x1b0] ss:$8 sps:$4 sm:$0xff]  }
 0x22b   : > { %2020 = vmatprep.subr.bf16.mxu0 %v2923_v28  ;;  %v3012_v28 = vld [vmem:[%s3559_s20 + $0x3b0] ss:$8 sps:$4 sm:$0xff]  }
 0x22d   : > { %1939 = vmatpush1.bf16.msra.mxu1 %v2925_v29  ;;  %v3017_v29 = vld [vmem:[%s3559_s20 + $0x1c4] ss:$8 sps:$4 sm:$0xff]  }
 0x22e   : > { %2021 = vmatpush1.bf16.msra.mxu0 %v2926_v30  ;;  %1940 = vmatprep.subr.bf16.mxu1 %v2927_v31  ;;  %v3020_v30 = vld [vmem:[%s3559_s20 + $0x3c4] ss:$8 sps:$4 sm:$0xff]   ;;  %v3015_v31 = vld [vmem:[%s3559_s20 + $0x1c0] ss:$8 sps:$4 sm:$0xff]  }
 0x22f   : > { %2022 = vmatprep.subr.bf16.mxu0 %v2929_v32  ;;  %v3018_v32 = vld [vmem:[%s3559_s20 + $0x3c0] ss:$8 sps:$4 sm:$0xff]  }
 0x231   : > { %1941 = vmatpush1.bf16.msra.mxu1 %v2931_v33  ;;  %v3023_v33 = vld [vmem:[%s3559_s20 + $0x1d4] ss:$8 sps:$4 sm:$0xff]  }
 0x232   : > { %2023 = vmatpush1.bf16.msra.mxu0 %v2932_v34  ;;  %1942 = vmatprep.subr.bf16.mxu1 %v2933_v42  ;;  %v3026_v34 = vld [vmem:[%s3559_s20 + $0x3d4] ss:$8 sps:$4 sm:$0xff]   ;;  %v3021_v42 = vld [vmem:[%s3559_s20 + $0x1d0] ss:$8 sps:$4 sm:$0xff]  }
 0x233   : > { %2024 = vmatprep.subr.bf16.mxu0 %v2935_v43  ;;  %v3024_v43 = vld [vmem:[%s3559_s20 + $0x3d0] ss:$8 sps:$4 sm:$0xff]  }
 0x235   : > { %1943 = vmatpush1.bf16.msra.mxu1 %v2937_v44  ;;  %v3029_v44 = vld [vmem:[%s3559_s20 + $0x1e4] ss:$8 sps:$4 sm:$0xff]  }
 0x236   : > { %2025 = vmatpush1.bf16.msra.mxu0 %v2938_v45  ;;  %1953 = vmatprep.subr.bf16.mxu1 %v2943_v46  ;;  %v3032_v45 = vld [vmem:[%s3559_s20 + $0x3e4] ss:$8 sps:$4 sm:$0xff]   ;;  %v3027_v46 = vld [vmem:[%s3559_s20 + $0x1e0] ss:$8 sps:$4 sm:$0xff]  }
 0x237   : > { %2035 = vmatprep.subr.bf16.mxu0 %v2948_v47  ;;  %v3030_v47 = vld [vmem:[%s3559_s20 + $0x3e0] ss:$8 sps:$4 sm:$0xff]  }
 0x238   : > { %1945 = vmatmul.mubr.bf16.vlgmr.msra.gmra.mrb[0].mxu1 %v2536_v48  ;;  %v3035_v48 = vld [vmem:[%s3559_s20 + $0x1f4] ss:$8 sps:$4 sm:$0xff]  }
 0x239   : > { %2027 = vmatmul.mubr.bf16.vlgmr.msra.gmra.mrb[0].mxu0 %v2540_v49  ;;  %1954 = vmatpush1.bf16.msra.mxu1 %v2941_v61  ;;  %v3038_v49 = vld [vmem:[%s3559_s20 + $0x3f4] ss:$8 sps:$4 sm:$0xff]   ;;  %v3033_v61 = vld [vmem:[%s3559_s20 + $0x1f0] ss:$8 sps:$4 sm:$0xff]  }
 0x23a   : > { %2036 = vmatpush1.bf16.msra.mxu0 %v2946_v51  ;;  %1955 = vmatprep.subr.bf16.mxu1 %v2951_v52  ;;  %v3036_v51 = vld [vmem:[%s3559_s20 + $0x3f0] ss:$8 sps:$4 sm:$0xff]   ;;  %v2538_v52 = vcombine.low %v3809_v53, %v3809_v53 }
 0x23b   : > { %2037 = vmatprep.subr.bf16.mxu0 %v2954_v54  ;;  %1985 = vmatprep.mubr.bf16.mxu1 %v2539_v17  ;;  %v2542_v54 = vcombine.low %v3811_v15, %v3811_v15 }
 0x23c   : > { %2067 = vmatprep.mubr.bf16.mxu0 %v2543_v19 }
 0x23d   : > { %1956 = vmatpush1.bf16.msra.mxu1 %v2949_v56  ;;  %v3043_v56 = vld [vmem:[%s3565_s14 + $0x40] sm:$0xff]  }
 0x23e   : > { %2038 = vmatpush1.bf16.msra.mxu0 %v2952_v57  ;;  %1957 = vmatprep.subr.bf16.mxu1 %v2957_v60  ;;  %v3044_v57 = vld [vmem:[%s3565_s14] sm:$0xff]   ;;  %v3045_v60 = vld [vmem:[%s3565_s14 + $0x48] sm:$0xff]  }
 0x23f   : > { %2039 = vmatprep.subr.bf16.mxu0 %v2960_v55  ;;  %v3046_v55 = vld [vmem:[%s3565_s14 + $0x8] sm:$0xff]  }
 0x241   : > { %1958 = vmatpush1.bf16.msra.mxu1 %v2955_v0  ;;  %v3047_v0 = vld [vmem:[%s3565_s14 + $0x50] sm:$0xff]  }
 0x242   : > { %2040 = vmatpush1.bf16.msra.mxu0 %v2958_v4  ;;  %1959 = vmatprep.subr.bf16.mxu1 %v2963_v63  ;;  %v3048_v4 = vld [vmem:[%s3565_s14 + $0x10] sm:$0xff]   ;;  %v3049_v63 = vld [vmem:[%s3565_s14 + $0x58] sm:$0xff]  }
 0x243   : > { %2041 = vmatprep.subr.bf16.mxu0 %v2966_v11  ;;  %v3050_v11 = vld [vmem:[%s3565_s14 + $0x18] sm:$0xff]  }
 0x245   : > { %1960 = vmatpush1.bf16.msra.mxu1 %v2961_v13  ;;  %v3051_v13 = vld [vmem:[%s3565_s14 + $0x60] sm:$0xff]  }
 0x246   : > { %2042 = vmatpush1.bf16.msra.mxu0 %v2964_v38  ;;  %1961 = vmatprep.subr.bf16.mxu1 %v2969_v18  ;;  %v3052_v38 = vld [vmem:[%s3565_s14 + $0x20] sm:$0xff]   ;;  %v3053_v18 = vld [vmem:[%s3565_s14 + $0x68] sm:$0xff]  }
 0x247   : > { %2043 = vmatprep.subr.bf16.mxu0 %v2972_v50  ;;  %v3054_v50 = vld [vmem:[%s3565_s14 + $0x28] sm:$0xff]  }
 0x249   : > { %1962 = vmatpush1.bf16.msra.mxu1 %v2967_v62  ;;  %v3055_v62 = vld [vmem:[%s3565_s14 + $0x70] sm:$0xff]  }
 0x24a   : > { %2044 = vmatpush1.bf16.msra.mxu0 %v2970_v2  ;;  %1963 = vmatprep.subr.bf16.mxu1 %v2975_v6  ;;  %v3056_v2 = vld [vmem:[%s3565_s14 + $0x30] sm:$0xff]   ;;  %v3057_v6 = vld [vmem:[%s3565_s14 + $0x78] sm:$0xff]  }
 0x24b   : > { %2045 = vmatprep.subr.bf16.mxu0 %v2978_v7  ;;  %v3058_v7 = vld [vmem:[%s3565_s14 + $0x38] sm:$0xff]  }
 0x24d   : > { %1964 = vmatpush1.bf16.msra.mxu1 %v2973_v1 }
 0x24e   : > { %2046 = vmatpush1.bf16.msra.mxu0 %v2976_v9  ;;  %1965 = vmatprep.subr.bf16.mxu1 %v2981_v8 }
 0x24f   : > { %2047 = vmatprep.subr.bf16.mxu0 %v2984_v10 }
 0x251   : > { %1966 = vmatpush1.bf16.msra.mxu1 %v2979_v12 }
 0x252   : > { %2048 = vmatpush1.bf16.msra.mxu0 %v2982_v14  ;;  %1967 = vmatprep.subr.bf16.mxu1 %v2987_v59 }
 0x253   : > { %2049 = vmatprep.subr.bf16.mxu0 %v2990_v16 }
 0x255   : > { %1968 = vmatpush1.bf16.msra.mxu1 %v2985_v20 }
 0x256   : > { %2050 = vmatpush1.bf16.msra.mxu0 %v2988_v21  ;;  %1969 = vmatprep.subr.bf16.mxu1 %v2993_v58 }
 0x257   : > { %2051 = vmatprep.subr.bf16.mxu0 %v2996_v22 }
 0x259   : > { %1970 = vmatpush1.bf16.msra.mxu1 %v2991_v5 }
 0x25a   : > { %2052 = vmatpush1.bf16.msra.mxu0 %v2994_v23  ;;  %1971 = vmatprep.subr.bf16.mxu1 %v2999_v24 }
 0x25b   : > { %2053 = vmatprep.subr.bf16.mxu0 %v3002_v25 }
 0x25d   : > { %1972 = vmatpush1.bf16.msra.mxu1 %v2997_v27 }
 0x25e   : > { %2054 = vmatpush1.bf16.msra.mxu0 %v3000_v35  ;;  %1973 = vmatprep.subr.bf16.mxu1 %v3005_v36 }
 0x25f   : > { %2055 = vmatprep.subr.bf16.mxu0 %v3008_v37 }
 0x261   : > { %1974 = vmatpush1.bf16.msra.mxu1 %v3003_v39 }
 0x262   : > { %2056 = vmatpush1.bf16.msra.mxu0 %v3006_v3  ;;  %1975 = vmatprep.subr.bf16.mxu1 %v3011_v40 }
 0x263   : > { %2057 = vmatprep.subr.bf16.mxu0 %v3014_v41 }
 0x265   : > { %1976 = vmatpush1.bf16.msra.mxu1 %v3009_v26 }
 0x266   : > { %2058 = vmatpush1.bf16.msra.mxu0 %v3012_v28  ;;  %1977 = vmatprep.subr.bf16.mxu1 %v3017_v29 }
 0x267   : > { %2059 = vmatprep.subr.bf16.mxu0 %v3020_v30 }
 0x269   : > { %1978 = vmatpush1.bf16.msra.mxu1 %v3015_v31 }
 0x26a   : > { %2060 = vmatpush1.bf16.msra.mxu0 %v3018_v32  ;;  %1979 = vmatprep.subr.bf16.mxu1 %v3023_v33 }
 0x26b   : > { %2061 = vmatprep.subr.bf16.mxu0 %v3026_v34 }
 0x26d   : > { %1980 = vmatpush1.bf16.msra.mxu1 %v3021_v42 }
 0x26e   : > { %2062 = vmatpush1.bf16.msra.mxu0 %v3024_v43  ;;  %1981 = vmatprep.subr.bf16.mxu1 %v3029_v44 }
 0x26f   : > { %2063 = vmatprep.subr.bf16.mxu0 %v3032_v45 }
 0x271   : > { %1982 = vmatpush1.bf16.msra.mxu1 %v3027_v46 }
 0x272   : > { %2064 = vmatpush1.bf16.msra.mxu0 %v3030_v47  ;;  %1983 = vmatprep.subr.bf16.mxu1 %v3035_v48 }
 0x273   : > { %2065 = vmatprep.subr.bf16.mxu0 %v3038_v49 }
 0x275   : > { %1984 = vmatpush1.bf16.msra.mxu1 %v3033_v61 }
 0x276   : > { %2066 = vmatpush1.bf16.msra.mxu0 %v3036_v51  ;;  %2701 = vmatprep.subr.bf16.mxu1 %v3043_v56  ;;  %v2123_v56 = vlaneseq }
 0x278   : > { %1986 = vmatmul.mubr.bf16.vlgmr.msra.gmra.mrb[0].mxu1 %v2538_v52  ;;  %v3300_v52 = vmov 1966171168  }
 0x279   : > { %2068 = vmatmul.mubr.bf16.vlgmr.msra.gmra.mrb[0].mxu0 %v2542_v54  ;;  %2702 = vmatpush3.bf16.msra.mxu1 %v3044_v57  ;;  %v2121_v54 = vunpack.c.l.s4 %v3300_v52 }
 0x27a   : > { %2703 = vmatprep.subr.bf16.mxu1 %v3045_v60  ;;  %v2124_v60 = vshrl.u32 %v2123_v56, 7 }
 0x27b   : > { %v2122_v57 = vunpack.c.0.s8 %v2121_v54 }
 0x27d   : > { %2704 = vmatpush3.bf16.msra.mxu1 %v3046_v55 }
 0x27e   : > { %2705 = vmatprep.subr.bf16.mxu1 %v3047_v0  ;;  %v2125_v0 = vsub.s32 %v2122_v57, %v2124_v60 }
 0x281   : > { %2706 = vmatpush3.bf16.msra.mxu1 %v3048_v4 }
 0x282   : > { %2707 = vmatprep.subr.bf16.mxu1 %v3049_v63 }
 0x285   : > { %2708 = vmatpush3.bf16.msra.mxu1 %v3050_v11 }
 0x286   : > { %2709 = vmatprep.subr.bf16.mxu1 %v3051_v13  ;;  %v2076_v13 = vld [vmem:[%s3571_s16] ss:$8 sm:$0x3] }
 0x289   : > { %2710 = vmatpush3.bf16.msra.mxu1 %v3052_v38 }
 0x28a   : > { %2711 = vmatprep.subr.bf16.mxu1 %v3053_v18  ;;  %v2139_v18 = vsub.s32 0, %v2124_v60 }
 0x28d   : > { %2712 = vmatpush3.bf16.msra.mxu1 %v3054_v50  ;;  %v2143_v50 = vsub.s32 1, %v2124_v60 }
 0x28e   : > { %2713 = vmatprep.subr.bf16.mxu1 %v3055_v62 }
 0x291   : > { %2714 = vmatpush3.bf16.msra.mxu1 %v3056_v2 }
 0x292   : > { %2715 = vmatprep.subr.bf16.mxu1 %v3057_v6 }
 0x295   : > { %2716 = vmatpush3.bf16.msra.mxu1 %v3058_v7 }
 0x34b   : > { %v1987_v1 = vpop.f32.mrb[0].mxu1 }
 0x34c   : > { %v2069_v9 = vpop.f32.mrb[0].mxu0  ;;  %v1989_v10 = vpop.f32.mrb[1].mxu1 }
 0x34d   : > { %v3873_v8 = vadd.f32 %v2069_v9, %v1987_v1  ;;  %v2071_v12 = vpop.f32.mrb[1].mxu0  ;;  %v1991_v53 = vpop.f32.mrb[2].mxu1 }
 0x34e   : > { %v2724_v14 = vadd.f32 %v2071_v12, %v1989_v10  ;;  %v2073_v15 = vpop.f32.mrb[2].mxu0  ;;  %v1992_v17 = vpop.f32.mrb[3].mxu1 }
 0x34f   : > { %v2079_v59 = vrot.slane %v3873_v8, 4  ;;  %v2091_v16 = vmul.f32 %v3873_v8, %v3873_v8  ;;  %v2074_v19 = vpop.f32.mrb[3].mxu0  ;;  %v2672_v15 = vld [vmem:[%s3571_s16 + $0x1] ss:$8 sm:$0x3] }
 0x350   : > { %v2085_v20 = vrot.slane %v2724_v14, 4  ;;  %v2092_v21 = vmul.f32 %v2724_v14, %v2724_v14 }
 0x351   : > { %v2080_v58 = vadd.f32 %v3873_v8, %v2079_v59  ;;  %v2093_v22 = vrot.slane %v2091_v16, 4 }
 0x352   : > { %v2086_v5 = vadd.f32 %v2724_v14, %v2085_v20  ;;  %v2099_v23 = vrot.slane %v2092_v21, 4 }
 0x353   : > { %v2081_v24 = vrot.slane %v2080_v58, 2  ;;  %v2094_v25 = vadd.f32 %v2093_v22, %v2091_v16 }
 0x354   : > { %v2087_v27 = vrot.slane %v2086_v5, 2  ;;  %v2100_v35 = vadd.f32 %v2099_v23, %v2092_v21 }
 0x355   : > { %v2082_v36 = vadd.f32 %v2081_v24, %v2080_v58  ;;  %v2095_v37 = vrot.slane %v2094_v25, 2 }
 0x356   : > { %v2088_v39 = vadd.f32 %v2087_v27, %v2086_v5  ;;  %v2101_v3 = vrot.slane %v2100_v35, 2 }
 0x357   : > { %v2083_v40 = vrot.slane %v2082_v36, 1  ;;  %v2096_v41 = vadd.f32 %v2095_v37, %v2094_v25  ;;  %v2187_v25 = vld [vmem:[#allocation3] sm:$0xff] }
 0x358   : > { %v2089_v26 = vrot.slane %v2088_v39, 1  ;;  %v2102_v28 = vadd.f32 %v2101_v3, %v2100_v35 }
 0x359   : > { %v2084_v29 = vadd.f32 %v2083_v40, %v2082_v36  ;;  %v2097_v30 = vrot.slane %v2096_v41, 1 }
 0x35a   : > { %v2090_v31 = vadd.f32 %v2089_v26, %v2088_v39  ;;  %v2103_v32 = vrot.slane %v2102_v28, 1 }
 0x35b   : > { %v2098_v33 = vadd.f32 %v2097_v30, %v2096_v41  ;;  %v2105_v34 = vmul.f32 0.125, %v2084_v29 }
 0x35c   : > { %v2104_v42 = vadd.f32 %v2103_v32, %v2102_v28  ;;  %v2106_v43 = vmul.f32 0.125, %v2090_v31 }
 0x35d   : > { %v2107_v44 = vmul.f32 0.125, %v2098_v33  ;;  %v2109_v45 = vmul.f32 %v2105_v34, %v2105_v34 }
 0x35e   : > { %v2108_v46 = vmul.f32 0.125, %v2104_v42  ;;  %v2110_v47 = vmul.f32 %v2106_v43, %v2106_v43 }
 0x35f   : > { %v2111_v48 = vsub.f32 %v2107_v44, %v2109_v45 }
 0x360   : > { %v2112_v49 = vsub.f32 %v2108_v46, %v2110_v47 }
 0x361   : > { %v2113_v61 = vadd.f32 1e-05, %v2111_v48 }
 0x362   : > { %v2114_v51 = vadd.f32 1e-05, %v2112_v49 }
 0x363   : > { %3059 = vrsqrt.f32 %v2113_v61 }
 0x364   : > { %3061 = vrsqrt.f32 %v2114_v51 }
 0x36d   : > { %v3060_v55 = vpop.eup %3059 }
 0x36e   : > { %v3062_v4 = vpop.eup %3061 }
 0x36f   : > { %v2119_v63 = vcombine.low %v3060_v55, %v3062_v4 }
 0x371   : > { %v2126_v11 = vrot.slane %v2119_v63, %v2125_v0 }
 0x373   : > { %v2133_v38 = vrot.slane %v2126_v11, %v2125_v0 }
 0x375   : > { %v2135_v62 = vmul.f32 %v2133_v38, %v2076_v13 }
 0x377   : > { %v2140_v2 = vrot.slane %v2135_v62, %v2139_v18  ;;  %v2144_v6 = vrot.slane %v2135_v62, %v2143_v50 }
 0x379   : > { %v2147_v7 = vmul.f32 %v2140_v2, %v2105_v34  ;;  %v2148_v1 = vmul.f32 %v2144_v6, %v2106_v43  ;;  %v2169_v9 = vmul.f32 %v2724_v14, %v2144_v6  ;;  %v2168_v10 = vmul.f32 %v3873_v8, %v2140_v2 }
 0x37b   : > { %v2151_v12 = vcombine.low %v2147_v7, %v2148_v1 }
 0x37d   : > { %v2158_v53 = vrot.slane %v2151_v12, %v2125_v0 }
 0x37f   : > { %v2165_v59 = vrot.slane %v2158_v53, %v2125_v0 }
 0x381   : > { %v2167_v16 = vsub.f32 %v2672_v15, %v2165_v59 }
 0x383   : > { %v2178_v17 = vrot.slane %v2167_v16, %v2143_v50  ;;  %v2174_v19 = vrot.slane %v2167_v16, %v2139_v18 }
 0x385   : > { %v2182_v20 = vadd.f32 %v2178_v17, %v2169_v9  ;;  %v2181_v21 = vadd.f32 %v2174_v19, %v2168_v10 }
 0x387   : > { %v2184_v58 = vmax.f32 %v2182_v20, 0.0  ;;  %v2183_v22 = vmax.f32 %v2181_v21, 0.0 }
 0x389   : > { %v2186_v5 = vpack.c.bf16 %v2184_v58, %v2184_v58  ;;  %v2185_v23 = vpack.c.bf16 %v2183_v22, %v2183_v22 }
 0x38b   : > { %2348 = vmatprep.mubr.bf16.mxu1 %v2186_v5 }
 0x38c   : > { %2349 = vmatmul.mubr.bf16.vlgmr.msra.gmra.mrb[4].mxu1 %v2185_v23 }
 0x45f   : > { %v2717_v24 = vpop.f32.mrb[4].mxu1  ;;  %2361 = sbr.rel (%p2689_p8) target bundleno = 1134 (0x46e), region = 72 }
 0x460   : > { %v2718_v14 = vpop.f32.mrb[5].mxu1 }
 0x461   : > { %v2719_v27 = vadd.f32 %v2718_v14, %v2717_v24  ;;  %v2720_v8 = vpop.f32.mrb[6].mxu1 }
 0x462   : > { %v2721_v35 = vpop.f32.mrb[7].mxu1 }
 0x463   : > { %v2356_v36 = vadd.f32 %v2719_v27, %v2187_v25 }
 0x465   : > { %2357 = vst [vmem:[#allocation3] sm:$0xff] %v2356_v36 }
 0x46c   : > { %v2362_v37 = vld [vmem:[#allocation3] sm:$0xff] }
 0x46d   : > { %2363 = vst [vmem:[#allocation13] sm:$0xff] %v2362_v37 }
 0x46e PF: > { %p2773_p12 = scmp.eq.s32.totalorder %s3356_s25, 3  ;;  %s3301_s21 = smov [#allocation13]  }
 0x46f   : > { %s2371_s19 = sshll.u32 %s3301_s21, 4  ;;  %s2372_s19 = int_to_ptr.vmem [resolvable:$true] %s2371_s19 }
 0x470   : > { %s3209_s17 = scalar_lea.vmem %s2372_s19, 128  ;;  %p3216_p5 = scmp.lt.s32.totalorder %s2372_s19, %s2372_s19 }
 0x471   : > { %p3210_p2 = scmp.ne.s32.totalorder %s2372_s19, %s3209_s17  ;;  %p3217_p13 = scmp.lt.s32.totalorder %s3209_s17, %s3209_s17 }
 0x473   : > { %p3211_p4 = pnand %p3210_p2, %p2773_p12  ;;  %p3218_p11 = por %p3217_p13, %p3216_p5 }
 0x475   : > { %p3212_p7 = pneg %p3211_p4 }
 0x477   : > { %p3219_p10 = pnand %p3218_p11, %p3212_p7 }
 0x479   : > { %3222 = shalt.err (!%p3219_p10)
}
 0x47a   : > { %s3223_s12 = scalar_lea.hbm %s3925_s6, 128 }
 0x47b   : > { %p3224_p9 = scmp.ne.s32.totalorder %s3925_s6, %s3223_s12  ;;  %p3229_p3 = scmp.lt.u32.totalorder %s3223_s12, %s3925_s6 }
 0x47d   : > { %p3225_p6 = pnand %p3224_p9, %p2773_p12 }
 0x47f   : > { %p3226_p1 = pneg %p3225_p6 }
 0x481   : > { %p3231_p0 = pnand %p3229_p3, %p3226_p1 }
 0x483   : > { %3234 = shalt.err (!%p3231_p0)
}
 0x484   : > { %2748 = dma.vmem_to_hbm [thread:$0]  (%p2773_p12), %s2372_s19, 128, %s3925_s6, [#allocation6]  }
 0x485   : > { %3268 = dma.done.wait (%p2773_p12), [#allocation6], 128  }
 0x486   : > { %3270 = vsyncadd (%p2773_p12), [#allocation6], 4294967168 }
 0x487 PF: > { %s3968_s24 = sld [smem:[#allocation20_spill]]  ;;  %s3969_s10 = sld [smem:[#allocation19_spill]] }
 0x488   : > { %s3970_s23 = sld [smem:[#allocation21_spill]]  ;;  %s3971_s21 = smov %s3277_s22 }
 0x48d   : > { %p19_p8 = scmp.ge.s32.totalorder %s3968_s24, 6   ;;  %s3972_s22 = smov %s3969_s10 }
 0x48f   :  { %21 = sbr.rel (!%p19_p8) target bundleno = 9 (0x9), region = 122 }
 0x496   :  { %2384 = vsyncpa [#allocation5], 1 }
 0x497   :  { %2386 = vsyncpa [#allocation5 + $0x1], 1 }
 0x498   :  { %2387 = vsyncpa [#allocation8], 1 }
 0x499   :  { %2389 = vsyncpa [#allocation8 + $0x1], 1 }
 0x49a   :  { %2390 = vsyncpa [#allocation11], 1 }
 0x49b   :  { %2391 = vsyncpa [#allocation6], 1 }
 0x49c   :  { %2393 = vsyncpa [#allocation6 + $0x1], 1 }

</bundles_post_ra>
